<compile_context>
chip_gen: v7x
topology: tpu7x:2x2x1
jax: 0.10.0
libtpu: 0.0.40
codegen_flags: <defaults>
</compile_context>

<pallas_src>
import math

import jax
import jax.numpy as jnp
from jax.experimental import pallas as pl
from jax.experimental.pallas import tpu as pltpu

EXP_BIT = 4
MANTISA_BIT = 8


# ----------------------------------------------------------------------------
# BFP quantization on a lane-packed (rows, Wo*Cout) tensor: shared exponent per
# contiguous group of `group` (=Cout) lanes, i.e. per spatial position over the
# channel dim -- same math as quantizing a (..., C) tensor over its last axis,
# but executed on the lane-dense layout.  Exponent handling is pure VALU.
# ----------------------------------------------------------------------------
def _bfp_quant_lane_groups(v, exp_bit, mant_bit, group):
    r, l = v.shape
    g = l // group
    emax = 2 ** (exp_bit - 1) - 1
    emin = -(2 ** (exp_bit - 1))
    # floor(log2(|v|)) via the IEEE754 exponent field; zeros give -127 which the
    # clip maps to emin (same as the log2 -> -inf -> clip path).
    bits = pltpu.bitcast(jnp.abs(v), jnp.int32)
    e = jnp.clip((bits >> 23) - 127, emin, emax)
    # Segmented max over each channel group (small (r, g, group) view).
    e_max = jnp.max(e.reshape(r, g, group), axis=-1, keepdims=True)
    e_max = jnp.broadcast_to(e_max, (r, g, group)).reshape(r, l)
    shift = (mant_bit - 2) - e_max                          # scale = 2 ** shift
    scale = pltpu.bitcast((shift + 127) << 23, jnp.float32)
    inv_scale = pltpu.bitcast((127 - shift) << 23, jnp.float32)
    qmax = 2.0 ** (mant_bit - 1) - 1.0
    qmin = -(2.0 ** (mant_bit - 1))
    q = jnp.clip(jnp.round(v * scale), qmin, qmax)
    return q * inv_scale                                    # exact pow2 multiply


# ----------------------------------------------------------------------------
# Fused Conv3d + bias + BFP (+ ReLU / residual-add) kernel, one output frame per
# grid step.
#   x_ref   : (1, Tp, Hp, Wp*Cin)       padded sample, bf16, W*Cin on lanes
#   w_ref   : (KT*KH, Wp*Cin, Wo*Cout)  W-banded weights, bf16
#   b_ref   : (1, Wo*Cout)              bias, tiled over Wo
#   skip_ref: (1, 1, Ho, Wo*Cout)       optional residual input (f32)
#   o_ref   : (1, 1, Ho, Wo*Cout)       lane-dense output block
# ----------------------------------------------------------------------------
def _make_conv_bfp_kernel(*, KT, KH, st, sh, Ho, Cout, epilogue,
                          quantize_skip, has_skip, exp_bit, mant_bit):

    def kernel(*refs):
        if has_skip:
            x_ref, w_ref, b_ref, skip_ref, o_ref = refs
        else:
            x_ref, w_ref, b_ref, o_ref = refs
            skip_ref = None

        LCo = o_ref.shape[-1]
        t0 = pl.program_id(1) * st

        # KT consecutive input frames covering this output frame (dynamic offset
        # only on the untiled T axis; H/W/C accesses are static).
        win = x_ref[0, pl.ds(t0, KT)]                       # (KT, Hp, Wp*Cin)

        acc = jnp.zeros((Ho, LCo), jnp.float32)
        tap = 0
        for kt in range(KT):
            frame = win[kt]                                 # (Hp, Wp*Cin)
            for kh in range(KH):
                # Contiguous slab; kw taps + W stride live in the banded weight.
                slab = frame[kh: kh + (Ho - 1) * sh + 1: sh, :]
                acc = acc + jnp.dot(slab, w_ref[tap],
                                    preferred_element_type=jnp.float32)
                tap += 1
        acc = acc + b_ref[...]                              # fused bias add

        q = _bfp_quant_lane_groups(acc, exp_bit, mant_bit, Cout)
        if epilogue == "relu":
            q = jnp.maximum(q, 0.0)
        elif epilogue == "add_relu":
            skip = skip_ref[...].reshape(Ho, LCo)
            if quantize_skip:
                skip = _bfp_quant_lane_groups(skip, exp_bit, mant_bit, Cout)
            q = jnp.maximum(q + skip, 0.0)
        # epilogue == "none": plain quantized conv output
        o_ref[...] = q.reshape(1, 1, Ho, LCo)               # lane-dense store

    return kernel


def conv3d_bfp(x, w, b, *, stride=1, padding=0, epilogue="none", skip=None,
               quantize_skip=False, exp_bit=EXP_BIT, mant_bit=MANTISA_BIT):
    """Fused Conv3d + BFP quantization (+ optional ReLU / residual add).

    x: (N,T,H,W,Cin) NDHWC f32; w: (KT,KH,KW,Cin,Cout) f32; b: (Cout,).
    epilogue:
      "relu"     -> relu(bfp(conv(x)+b))
      "none"     -> bfp(conv(x)+b)
      "add_relu" -> relu(bfp(conv(x)+b) + skip')  with
                    skip' = bfp(skip) if quantize_skip else skip
    skip is NDHWC with the same shape as the conv output.  Returns NDHWC f32.
    """
    st = (stride,) * 3 if isinstance(stride, int) else tuple(stride)
    pad = (padding,) * 3 if isinstance(padding, int) else tuple(padding)
    N, T, H, W, Cin = x.shape
    KT, KH, KW, _, Cout = w.shape

    xp = jnp.pad(x, ((0, 0), (pad[0],) * 2, (pad[1],) * 2, (pad[2],) * 2,
                     (0, 0)))
    Tp, Hp, Wp = T + 2 * pad[0], H + 2 * pad[1], W + 2 * pad[2]
    To = (Tp - KT) // st[0] + 1
    Ho = (Hp - KH) // st[1] + 1
    Wo = (Wp - KW) // st[2] + 1
    WC = Wp * Cin                     # input lane width
    LCo = Wo * Cout                   # output lane width

    # Activations: fold (W, Cin) into lanes, bf16 for the MXU / halved DMA.
    x2 = xp.reshape(N, Tp, Hp, WC).astype(jnp.bfloat16)

    # W-banded weights: Wband[kt,kh][(w,ci),(w_o,co)] = w[kt,kh, w - w_o*sw, ci, co]
    # for 0 <= w - w_o*sw < KW else 0.  Folds kw taps AND the W stride into one
    # dense lane-dense matmul per (kt,kh).
    sel = (jnp.arange(Wp)[:, None, None] ==
           jnp.arange(Wo)[None, None, :] * st[2] + jnp.arange(KW)[None, :, None])
    wband = jnp.einsum('wkv,abkio->abwivo', sel.astype(w.dtype), w)
    wband = wband.reshape(KT * KH, WC, LCo).astype(jnp.bfloat16)

    b2 = jnp.tile(b, Wo).reshape(1, LCo).astype(jnp.float32)

    has_skip = skip is not None
    kern = _make_conv_bfp_kernel(
        KT=KT, KH=KH, st=st[0], sh=st[1], Ho=Ho, Cout=Cout,
        epilogue=epilogue, quantize_skip=quantize_skip, has_skip=has_skip,
        exp_bit=exp_bit, mant_bit=mant_bit)

    in_specs = [
        pl.BlockSpec((1, Tp, Hp, WC), lambda n, t: (n, 0, 0, 0)),      # resident
        pl.BlockSpec((KT * KH, WC, LCo), lambda n, t: (0, 0, 0)),      # resident
        pl.BlockSpec((1, LCo), lambda n, t: (0, 0)),                   # resident
    ]
    args = [x2, wband, b2]
    if has_skip:
        in_specs.append(pl.BlockSpec((1, 1, Ho, LCo),
                                     lambda n, t: (n, t, 0, 0)))
        args.append(skip.reshape(N, To, Ho, LCo).astype(jnp.float32))

    flops = 2 * N * To * KT * KH * Ho * WC * LCo
    bytes_accessed = (x2.size * 2 + wband.size * 2 + b2.size * 4
                      + (N * To * Ho * LCo * 4 if has_skip else 0)
                      + N * To * Ho * LCo * 4)

    out = pl.pallas_call(
        kern,
        out_shape=jax.ShapeDtypeStruct((N, To, Ho, LCo), jnp.float32),
        grid=(N, To),
        in_specs=in_specs,
        out_specs=pl.BlockSpec((1, 1, Ho, LCo), lambda n, t: (n, t, 0, 0)),
        compiler_params=pltpu.CompilerParams(
            dimension_semantics=("parallel", "parallel"),
            vmem_limit_bytes=32 * 1024 * 1024),
        cost_estimate=pl.CostEstimate(flops=flops, transcendentals=0,
                                      bytes_accessed=bytes_accessed),
    )(*args)
    return out.reshape(N, To, Ho, Wo, Cout)


# ----------------------------------------------------------------------------
# ResBlock / ResLayer forward (matches BFP_SpatioTemporalResBlock / ResLayer)
# ----------------------------------------------------------------------------
def res_block_forward(x, blk, kernel_size):
    pad = kernel_size // 2
    w1, b1 = blk["conv1"]
    w2, b2 = blk["conv2"]

    if blk["downsample"]:
        # res = relu(bfp(conv1(x)))   (stride-2 conv)
        r = conv3d_bfp(x, w1, b1, stride=2, padding=pad, epilogue="relu")
        # skip = bfp(downsampleconv(x))  (1x1x1, stride 2 -> no im2col at all)
        wd, bd = blk["downsampleconv"]
        skip = conv3d_bfp(x, wd, bd, stride=2, padding=0, epilogue="none")
        # out = relu(bfp(conv2(r)) + skip)   (skip already quantized)
        return conv3d_bfp(r, w2, b2, stride=1, padding=pad,
                          epilogue="add_relu", skip=skip, quantize_skip=False)

    # res = relu(bfp(conv1(x)))
    r = conv3d_bfp(x, w1, b1, stride=1, padding=pad, epilogue="relu")
    # out = relu(bfp(conv2(r)) + bfp(x))  -- skip quantized inside the kernel
    return conv3d_bfp(r, w2, b2, stride=1, padding=pad,
                      epilogue="add_relu", skip=x, quantize_skip=True)


def res_layer_forward(x_ncdhw, layer_params, kernel_size):
    x = jnp.transpose(x_ncdhw, (0, 2, 3, 4, 1))      # NCDHW -> NDHWC
    for blk in layer_params:
        x = res_block_forward(x, blk, kernel_size)
    return jnp.transpose(x, (0, 4, 1, 2, 3))         # back to NCDHW


# ----------------------------------------------------------------------------
# Deterministic parameter init (PyTorch Conv3d default: U(-1/sqrt(fan_in), ...))
# ----------------------------------------------------------------------------
def init_conv_params(key, cin, cout, k):
    kt = kh = kw = k
    fan_in = cin * kt * kh * kw
    bound = 1.0 / math.sqrt(fan_in)
    k_w, k_b = jax.random.split(key)
    w = jax.random.uniform(k_w, (cout, cin, kt, kh, kw), jnp.float32,
                           -bound, bound)
    b = jax.random.uniform(k_b, (cout,), jnp.float32, -bound, bound)
    # PyTorch (Cout, Cin, KT, KH, KW) -> kernel layout (KT, KH, KW, Cin, Cout)
    return jnp.transpose(w, (2, 3, 4, 1, 0)), b


def init_layer_params(key, in_channels, out_channels, kernel_size, layer_size,
                      downsample=False):
    params = []
    for i in range(layer_size):
        key, k1, k2, k3 = jax.random.split(key, 4)
        ci = in_channels if i == 0 else out_channels
        ds = downsample and i == 0
        blk = {
            "downsample": ds,
            "conv1": init_conv_params(k1, ci, out_channels, kernel_size),
            "conv2": init_conv_params(k2, out_channels, out_channels,
                                      kernel_size),
        }
        if ds:
            blk["downsampleconv"] = init_conv_params(k3, ci, out_channels, 1)
        params.append(blk)
    return params


if __name__ == "__main__":
    key = jax.random.PRNGKey(0)
    k_params, k_x = jax.random.split(key)

    # BFP_SpatioTemporalResLayer(in=16, out=16, kernel_size=3, layer_size=2,
    #                            downsample=False, exp_bit=4, mantisa_bit=8)
    N, C, T, H, W = 2, 16, 4, 8, 8
    kernel_size, layer_size = 3, 2

    layer_params = init_layer_params(k_params, C, C, kernel_size, layer_size,
                                     downsample=False)
    x = jax.random.normal(k_x, (N, C, T, H, W), jnp.float32)   # NCDHW as PyTorch

    out = res_layer_forward(x, layer_params, kernel_size)
    out = jax.block_until_ready(out)
    assert out.shape == (N, C, T, H, W), out.shape
    assert bool(jnp.all(jnp.isfinite(out)))
    print("KERNEL_OK")
</pallas_src>

<mosaic_0001>
module attributes {stable_mosaic.version = 11 : i64} {
  func.func @kernel(%arg0: i32, %arg1: i32, %arg2: memref<1x6x10x160xbf16, #tpu.memory_space<vmem>>, %arg3: memref<9x160x128xbf16, #tpu.memory_space<vmem>>, %arg4: memref<1x128xf32, #tpu.memory_space<vmem>>, %arg5: memref<1x1x8x128xf32, #tpu.memory_space<vmem>>) attributes {dimension_semantics = [#tpu.dimension_semantics<parallel>, #tpu.dimension_semantics<parallel>], iteration_bounds = array<i64: 2, 4>, scalar_prefetch = 0 : i64, scratch_operands = 0 : i64, tpu.core_type = #tpu.core_type<tc>, window_params = [{transform_indices = @transform_0, window_bounds = array<i64: 1, 6, 10, 160>}, {pipeline_mode = #tpu.pipeline_mode<synchronous>, transform_indices = @transform_1, window_bounds = array<i64: 9, 160, 128>}, {pipeline_mode = #tpu.pipeline_mode<synchronous>, transform_indices = @transform_2, window_bounds = array<i64: 1, 128>}, {transform_indices = @transform_3, window_bounds = array<i64: 1, 1, 8, 128>}]} {
    %c1_i32 = arith.constant 1 : i32
    %0 = arith.muli %arg1, %c1_i32 : i32
    %c0 = arith.constant 0 : index
    %1 = arith.index_cast %0 : i32 to index
    %c0_0 = arith.constant 0 : index
    %c0_1 = arith.constant 0 : index
    %2 = vector.load %arg2[%c0, %1, %c0_0, %c0_1] : memref<1x6x10x160xbf16, #tpu.memory_space<vmem>>, vector<1x3x10x160xbf16>
    %3 = vector.shape_cast %2 : vector<1x3x10x160xbf16> to vector<3x10x160xbf16>
    %cst = arith.constant 0.000000e+00 : f32
    %4 = vector.broadcast %cst : f32 to vector<8x128xf32>
    %5 = vector.extract_strided_slice %3 {offsets = [0, 0, 0], sizes = [1, 10, 160], strides = [1, 1, 1]} : vector<3x10x160xbf16> to vector<1x10x160xbf16>
    %6 = vector.shape_cast %5 : vector<1x10x160xbf16> to vector<10x160xbf16>
    %7 = vector.extract_strided_slice %6 {offsets = [0, 0], sizes = [8, 160], strides = [1, 1]} : vector<10x160xbf16> to vector<8x160xbf16>
    %c0_2 = arith.constant 0 : index
    %c0_3 = arith.constant 0 : index
    %c0_4 = arith.constant 0 : index
    %8 = vector.load %arg3[%c0_2, %c0_3, %c0_4] : memref<9x160x128xbf16, #tpu.memory_space<vmem>>, vector<1x160x128xbf16>
    %9 = vector.shape_cast %8 : vector<1x160x128xbf16> to vector<160x128xbf16>
    %cst_5 = arith.constant dense<0.000000e+00> : vector<8x128xf32>
    %10 = tpu.matmul %7, %9, %cst_5 {dimension_numbers = #tpu.dot_dimension_numbers<[1], [0], [0], [1], [0, 0, 1, 1], [], []>} : vector<8x160xbf16>, vector<160x128xbf16>, vector<8x128xf32> -> vector<8x128xf32>
    %11 = arith.addf %4, %10 : vector<8x128xf32>
    %12 = vector.extract_strided_slice %6 {offsets = [1, 0], sizes = [8, 160], strides = [1, 1]} : vector<10x160xbf16> to vector<8x160xbf16>
    %c1 = arith.constant 1 : index
    %c0_6 = arith.constant 0 : index
    %c0_7 = arith.constant 0 : index
    %13 = vector.load %arg3[%c1, %c0_6, %c0_7] : memref<9x160x128xbf16, #tpu.memory_space<vmem>>, vector<1x160x128xbf16>
    %14 = vector.shape_cast %13 : vector<1x160x128xbf16> to vector<160x128xbf16>
    %cst_8 = arith.constant dense<0.000000e+00> : vector<8x128xf32>
    %15 = tpu.matmul %12, %14, %cst_8 {dimension_numbers = #tpu.dot_dimension_numbers<[1], [0], [0], [1], [0, 0, 1, 1], [], []>} : vector<8x160xbf16>, vector<160x128xbf16>, vector<8x128xf32> -> vector<8x128xf32>
    %16 = arith.addf %11, %15 : vector<8x128xf32>
    %17 = vector.extract_strided_slice %6 {offsets = [2, 0], sizes = [8, 160], strides = [1, 1]} : vector<10x160xbf16> to vector<8x160xbf16>
    %c2 = arith.constant 2 : index
    %c0_9 = arith.constant 0 : index
    %c0_10 = arith.constant 0 : index
    %18 = vector.load %arg3[%c2, %c0_9, %c0_10] : memref<9x160x128xbf16, #tpu.memory_space<vmem>>, vector<1x160x128xbf16>
    %19 = vector.shape_cast %18 : vector<1x160x128xbf16> to vector<160x128xbf16>
    %cst_11 = arith.constant dense<0.000000e+00> : vector<8x128xf32>
    %20 = tpu.matmul %17, %19, %cst_11 {dimension_numbers = #tpu.dot_dimension_numbers<[1], [0], [0], [1], [0, 0, 1, 1], [], []>} : vector<8x160xbf16>, vector<160x128xbf16>, vector<8x128xf32> -> vector<8x128xf32>
    %21 = arith.addf %16, %20 : vector<8x128xf32>
    %22 = vector.extract_strided_slice %3 {offsets = [1, 0, 0], sizes = [1, 10, 160], strides = [1, 1, 1]} : vector<3x10x160xbf16> to vector<1x10x160xbf16>
    %23 = vector.shape_cast %22 : vector<1x10x160xbf16> to vector<10x160xbf16>
    %24 = vector.extract_strided_slice %23 {offsets = [0, 0], sizes = [8, 160], strides = [1, 1]} : vector<10x160xbf16> to vector<8x160xbf16>
    %c3 = arith.constant 3 : index
    %c0_12 = arith.constant 0 : index
    %c0_13 = arith.constant 0 : index
    %25 = vector.load %arg3[%c3, %c0_12, %c0_13] : memref<9x160x128xbf16, #tpu.memory_space<vmem>>, vector<1x160x128xbf16>
    %26 = vector.shape_cast %25 : vector<1x160x128xbf16> to vector<160x128xbf16>
    %cst_14 = arith.constant dense<0.000000e+00> : vector<8x128xf32>
    %27 = tpu.matmul %24, %26, %cst_14 {dimension_numbers = #tpu.dot_dimension_numbers<[1], [0], [0], [1], [0, 0, 1, 1], [], []>} : vector<8x160xbf16>, vector<160x128xbf16>, vector<8x128xf32> -> vector<8x128xf32>
    %28 = arith.addf %21, %27 : vector<8x128xf32>
    %29 = vector.extract_strided_slice %23 {offsets = [1, 0], sizes = [8, 160], strides = [1, 1]} : vector<10x160xbf16> to vector<8x160xbf16>
    %c4 = arith.constant 4 : index
    %c0_15 = arith.constant 0 : index
    %c0_16 = arith.constant 0 : index
    %30 = vector.load %arg3[%c4, %c0_15, %c0_16] : memref<9x160x128xbf16, #tpu.memory_space<vmem>>, vector<1x160x128xbf16>
    %31 = vector.shape_cast %30 : vector<1x160x128xbf16> to vector<160x128xbf16>
    %cst_17 = arith.constant dense<0.000000e+00> : vector<8x128xf32>
    %32 = tpu.matmul %29, %31, %cst_17 {dimension_numbers = #tpu.dot_dimension_numbers<[1], [0], [0], [1], [0, 0, 1, 1], [], []>} : vector<8x160xbf16>, vector<160x128xbf16>, vector<8x128xf32> -> vector<8x128xf32>
    %33 = arith.addf %28, %32 : vector<8x128xf32>
    %34 = vector.extract_strided_slice %23 {offsets = [2, 0], sizes = [8, 160], strides = [1, 1]} : vector<10x160xbf16> to vector<8x160xbf16>
    %c5 = arith.constant 5 : index
    %c0_18 = arith.constant 0 : index
    %c0_19 = arith.constant 0 : index
    %35 = vector.load %arg3[%c5, %c0_18, %c0_19] : memref<9x160x128xbf16, #tpu.memory_space<vmem>>, vector<1x160x128xbf16>
    %36 = vector.shape_cast %35 : vector<1x160x128xbf16> to vector<160x128xbf16>
    %cst_20 = arith.constant dense<0.000000e+00> : vector<8x128xf32>
    %37 = tpu.matmul %34, %36, %cst_20 {dimension_numbers = #tpu.dot_dimension_numbers<[1], [0], [0], [1], [0, 0, 1, 1], [], []>} : vector<8x160xbf16>, vector<160x128xbf16>, vector<8x128xf32> -> vector<8x128xf32>
    %38 = arith.addf %33, %37 : vector<8x128xf32>
    %39 = vector.extract_strided_slice %3 {offsets = [2, 0, 0], sizes = [1, 10, 160], strides = [1, 1, 1]} : vector<3x10x160xbf16> to vector<1x10x160xbf16>
    %40 = vector.shape_cast %39 : vector<1x10x160xbf16> to vector<10x160xbf16>
    %41 = vector.extract_strided_slice %40 {offsets = [0, 0], sizes = [8, 160], strides = [1, 1]} : vector<10x160xbf16> to vector<8x160xbf16>
    %c6 = arith.constant 6 : index
    %c0_21 = arith.constant 0 : index
    %c0_22 = arith.constant 0 : index
    %42 = vector.load %arg3[%c6, %c0_21, %c0_22] : memref<9x160x128xbf16, #tpu.memory_space<vmem>>, vector<1x160x128xbf16>
    %43 = vector.shape_cast %42 : vector<1x160x128xbf16> to vector<160x128xbf16>
    %cst_23 = arith.constant dense<0.000000e+00> : vector<8x128xf32>
    %44 = tpu.matmul %41, %43, %cst_23 {dimension_numbers = #tpu.dot_dimension_numbers<[1], [0], [0], [1], [0, 0, 1, 1], [], []>} : vector<8x160xbf16>, vector<160x128xbf16>, vector<8x128xf32> -> vector<8x128xf32>
    %45 = arith.addf %38, %44 : vector<8x128xf32>
    %46 = vector.extract_strided_slice %40 {offsets = [1, 0], sizes = [8, 160], strides = [1, 1]} : vector<10x160xbf16> to vector<8x160xbf16>
    %c7 = arith.constant 7 : index
    %c0_24 = arith.constant 0 : index
    %c0_25 = arith.constant 0 : index
    %47 = vector.load %arg3[%c7, %c0_24, %c0_25] : memref<9x160x128xbf16, #tpu.memory_space<vmem>>, vector<1x160x128xbf16>
    %48 = vector.shape_cast %47 : vector<1x160x128xbf16> to vector<160x128xbf16>
    %cst_26 = arith.constant dense<0.000000e+00> : vector<8x128xf32>
    %49 = tpu.matmul %46, %48, %cst_26 {dimension_numbers = #tpu.dot_dimension_numbers<[1], [0], [0], [1], [0, 0, 1, 1], [], []>} : vector<8x160xbf16>, vector<160x128xbf16>, vector<8x128xf32> -> vector<8x128xf32>
    %50 = arith.addf %45, %49 : vector<8x128xf32>
    %51 = vector.extract_strided_slice %40 {offsets = [2, 0], sizes = [8, 160], strides = [1, 1]} : vector<10x160xbf16> to vector<8x160xbf16>
    %c8 = arith.constant 8 : index
    %c0_27 = arith.constant 0 : index
    %c0_28 = arith.constant 0 : index
    %52 = vector.load %arg3[%c8, %c0_27, %c0_28] : memref<9x160x128xbf16, #tpu.memory_space<vmem>>, vector<1x160x128xbf16>
    %53 = vector.shape_cast %52 : vector<1x160x128xbf16> to vector<160x128xbf16>
    %cst_29 = arith.constant dense<0.000000e+00> : vector<8x128xf32>
    %54 = tpu.matmul %51, %53, %cst_29 {dimension_numbers = #tpu.dot_dimension_numbers<[1], [0], [0], [1], [0, 0, 1, 1], [], []>} : vector<8x160xbf16>, vector<160x128xbf16>, vector<8x128xf32> -> vector<8x128xf32>
    %55 = arith.addf %50, %54 : vector<8x128xf32>
    %c0_30 = arith.constant 0 : index
    %c0_31 = arith.constant 0 : index
    %56 = vector.load %arg4[%c0_30, %c0_31] : memref<1x128xf32, #tpu.memory_space<vmem>>, vector<1x128xf32>
    %57 = vector.broadcast %56 : vector<1x128xf32> to vector<8x128xf32>
    %58 = arith.addf %55, %57 : vector<8x128xf32>
    %59 = math.absf %58 : vector<8x128xf32>
    %60 = tpu.bitcast %59 : vector<8x128xf32> -> vector<8x128xi32>
    %c23_i32 = arith.constant 23 : i32
    %61 = vector.broadcast %c23_i32 : i32 to vector<8x128xi32>
    %62 = arith.shrsi %60, %61 : vector<8x128xi32>
    %c127_i32 = arith.constant 127 : i32
    %63 = vector.broadcast %c127_i32 : i32 to vector<8x128xi32>
    %64 = arith.subi %62, %63 : vector<8x128xi32>
    %c-8_i32 = arith.constant -8 : i32
    %c7_i32 = arith.constant 7 : i32
    %65 = vector.broadcast %c-8_i32 : i32 to vector<8x128xi32>
    %66 = arith.maxsi %65, %64 : vector<8x128xi32>
    %67 = vector.broadcast %c7_i32 : i32 to vector<8x128xi32>
    %68 = arith.minsi %67, %66 : vector<8x128xi32>
    %69 = vector.shape_cast %68 : vector<8x128xi32> to vector<8x8x16xi32>
    %cst_32 = arith.constant dense<-2147483648> : vector<8x8xi32>
    %70 = vector.multi_reduction <maxsi>, %69, %cst_32 [2] : vector<8x8x16xi32> to vector<8x8xi32>
    %71 = vector.shape_cast %70 : vector<8x8xi32> to vector<8x8x1xi32>
    %72 = vector.shape_cast %71 : vector<8x8x1xi32> to vector<8x8x1xi32>
    %73 = vector.broadcast %72 : vector<8x8x1xi32> to vector<8x8x16xi32>
    %74 = vector.shape_cast %73 : vector<8x8x16xi32> to vector<8x128xi32>
    %c6_i32 = arith.constant 6 : i32
    %75 = vector.broadcast %c6_i32 : i32 to vector<8x128xi32>
    %76 = arith.subi %75, %74 : vector<8x128xi32>
    %c127_i32_33 = arith.constant 127 : i32
    %77 = vector.broadcast %c127_i32_33 : i32 to vector<8x128xi32>
    %78 = arith.addi %76, %77 : vector<8x128xi32>
    %c23_i32_34 = arith.constant 23 : i32
    %79 = vector.broadcast %c23_i32_34 : i32 to vector<8x128xi32>
    %80 = arith.shli %78, %79 : vector<8x128xi32>
    %81 = tpu.bitcast %80 : vector<8x128xi32> -> vector<8x128xf32>
    %c127_i32_35 = arith.constant 127 : i32
    %82 = vector.broadcast %c127_i32_35 : i32 to vector<8x128xi32>
    %83 = arith.subi %82, %76 : vector<8x128xi32>
    %c23_i32_36 = arith.constant 23 : i32
    %84 = vector.broadcast %c23_i32_36 : i32 to vector<8x128xi32>
    %85 = arith.shli %83, %84 : vector<8x128xi32>
    %86 = tpu.bitcast %85 : vector<8x128xi32> -> vector<8x128xf32>
    %87 = arith.mulf %58, %81 : vector<8x128xf32>
    %88 = math.roundeven %87 : vector<8x128xf32>
    %cst_37 = arith.constant -1.280000e+02 : f32
    %cst_38 = arith.constant 1.270000e+02 : f32
    %89 = vector.broadcast %cst_37 : f32 to vector<8x128xf32>
    %90 = arith.maximumf %89, %88 : vector<8x128xf32>
    %91 = vector.broadcast %cst_38 : f32 to vector<8x128xf32>
    %92 = arith.minimumf %91, %90 : vector<8x128xf32>
    %93 = arith.mulf %92, %86 : vector<8x128xf32>
    %cst_39 = arith.constant 0.000000e+00 : f32
    %94 = vector.broadcast %cst_39 : f32 to vector<8x128xf32>
    %95 = arith.maximumf %93, %94 : vector<8x128xf32>
    %96 = vector.shape_cast %95 : vector<8x128xf32> to vector<1x1x8x128xf32>
    %c0_40 = arith.constant 0 : index
    %c0_41 = arith.constant 0 : index
    %c0_42 = arith.constant 0 : index
    %c0_43 = arith.constant 0 : index
    %97 = vector.load %arg5[%c0_40, %c0_41, %c0_42, %c0_43] : memref<1x1x8x128xf32, #tpu.memory_space<vmem>>, vector<1x1x8x128xf32>
    tpu.vector_store %arg5[%c0_40, %c0_41, %c0_42, %c0_43], %96 {strides = array<i32>} : memref<1x1x8x128xf32, #tpu.memory_space<vmem>>, vector<1x1x8x128xf32>,
    return
  }
  func.func @transform_0(%arg0: i32, %arg1: i32) -> (i32, i32, i32, i32) {
    %c0_i32 = arith.constant 0 : i32
    %c0_i32_0 = arith.constant 0 : i32
    %c0_i32_1 = arith.constant 0 : i32
    %c0_i32_2 = arith.constant 0 : i32
    return %arg0, %c0_i32, %c0_i32_0, %c0_i32_1 : i32, i32, i32, i32
  }
  func.func @transform_1(%arg0: i32, %arg1: i32) -> (i32, i32, i32) {
    %c0_i32 = arith.constant 0 : i32
    %c0_i32_0 = arith.constant 0 : i32
    %c0_i32_1 = arith.constant 0 : i32
    %c0_i32_2 = arith.constant 0 : i32
    return %c0_i32, %c0_i32_0, %c0_i32_1 : i32, i32, i32
  }
  func.func @transform_2(%arg0: i32, %arg1: i32) -> (i32, i32) {
    %c0_i32 = arith.constant 0 : i32
    %c0_i32_0 = arith.constant 0 : i32
    %c0_i32_1 = arith.constant 0 : i32
    return %c0_i32, %c0_i32_0 : i32, i32
  }
  func.func @transform_3(%arg0: i32, %arg1: i32) -> (i32, i32, i32, i32) {
    %c0_i32 = arith.constant 0 : i32
    %c0_i32_0 = arith.constant 0 : i32
    %c0_i32_1 = arith.constant 0 : i32
    return %arg0, %arg1, %c0_i32, %c0_i32_0 : i32, i32, i32, i32
  }
}

</mosaic_0001>

<bundles_post_ra>
// kernel: tpu_custom_call.1
= control target key start
LH: loop header
LB: loop body
LE: loop exit
PB: predicated region body
PF: predicated region fallthrough
CT: control target
= control target key end

     0   :  { %8 = vsyncpa [#allocation3], 0  ;;  %s2855_s0 = inlined_call_operand.vmem [shape: bf16[2,6,10,160], index: 0, kind: input, shape index: {}]   ;;  %s2856_s1 = inlined_call_operand.hbm [shape: bf16[9,160,128], index: 1, kind: input, shape index: {}]   ;;  %s2857_s2 = inlined_call_operand.vmem [shape: f32[1,128], index: 2, kind: input, shape index: {}]   ;;  %s2858_s3 = inlined_call_operand.hbm [shape: f32[2,4,8,128], index: 3, kind: output, shape index: {}]  }
   0x1   :  { %9 = vsyncpa [#allocation4], 0 }
   0x2   :  { %11 = vsyncpa [#allocation4 + $0x1], 0  ;;  %s2473_s12 = smov 0   ;;  %s2475_s13 = smov 0  }
   0x3   :  { %s2477_s14 = smov 0   ;;  %s2479_s15 = smov 0  }
   0x4   :  { %s2481_s16 = smov 0   ;;  %s2483_s17 = smov 0  }
   0x5   :  { %s2485_s18 = smov 0   ;;  %s2487_s19 = smov 0  }
   0x6 LB: > { %s1983_s20 = sadd.s32 4294967295, %s2437_s19   ;;  %s1984_s21 = sadd.s32 4294967294, %s2437_s19   ;;  %s2437_s19 = sphi %s2487_s19, %s17_s19   ;;  %s2433_s18 = sphi %s2485_s18, %s2878_s18   ;;  %s2429_s17 = sphi %s2483_s17, %s2877_s17   ;;  %s2425_s16 = sphi %s2481_s16, %s2876_s16   ;;  %s2421_s15 = sphi %s2479_s15, %s2875_s15   ;;  %s2417_s14 = sphi %s2477_s14, %s2874_s14   ;;  %s2413_s13 = sphi %s2475_s13, %s2873_s13   ;;  %s2409_s12 = sphi %s2473_s12, %s2872_s12  }
   0x7   : > { %s26_s22 = sadd.s32 1, %s2429_s17  ;;  %s29_s23 = sadd.s32 1, %s2433_s18 }
   0x8   : > { %p27_p0 = scmp.ge.s32.totalorder %s26_s22, 4  ;;  %s106_s24 = sadd.s32 1, %s2417_s14 }
   0x9   : > { %p116_p1 = scmp.ne.s32.totalorder %s2417_s14, %s2413_s13  ;;  %p117_p2 = scmp.eq.s32.totalorder %s1983_s20, 7 }
   0xa   : > { %s2880_s22 = smov (%p27_p0, %s26_s22), 0  ;;  %s2882_s23 = smov (!%p27_p0, %s29_s23), %s2433_s18 }
   0xb   : > { %s102_s25 = ssub.s32 %s2429_s17, %s2880_s22  ;;  %p2525_p3 = por %p117_p2, %p116_p1 }
   0xc   : > { %p31_p4 = scmp.ge.s32.totalorder %s2882_s23, 2  ;;  %p122_p5 = scmp.ne.s32.totalorder %s2413_s13, %s2409_s12 }
   0xd   : > { %s2863_s26 = scalar_select %p2525_p3, 1, 0 }
   0xe   : > { %p123_p6 = scmp.eq.s32.totalorder %s1984_s21, 7  ;;  %p1985_p7 = scmp.ge.s32.totalorder %s2437_s19, 1 }
   0xf   : > { %s2884_s23 = smov (%p31_p4, %s2882_s23), 0  ;;  %p130_p9 = scmp.lt.s32.totalorder %s2437_s19, 9 }
  0x10   : > { %p2534_p8 = por %p123_p6, %p122_p5  ;;  %s101_s28 = ssub.s32 %s2433_s18, %s2884_s23 }
  0x11   : > { %s103_s29 = sor.u32 %s102_s25, %s101_s28  ;;  %p2541_p10 = pnand %p1985_p7, %p130_p9 }
  0x12   : > { %s2864_s27 = scalar_select %p2534_p8, 1, 0 }
  0x13   : > { %s2865_s30 = scalar_select %p2541_p10, 1, 0 }
  0x14   : > { %p104_p11 = scmp.eq.s32.totalorder %s103_s29, 0  ;;  %p2545_p12 = scmp.eq.s32.totalorder %s1983_s20, 0 }
  0x15   : > { %p2121_p13 = pneg %p2541_p10  ;;  %s2439_s6 = smov [#allocation2]  }
  0x16   : > { %s2866_s4 = scalar_select %p2545_p12, 1, 0 }
  0x17   : > { %s2552_s5 = scalar_select %p104_p11, %s2417_s14, %s106_s24  }
  0x18   : > { %s142_s7 = sshll.u32 %s2439_s6, 4  ;;  %p2556_p0 = pnand %p2545_p12, %p2121_p13  ;;  %s143_s7 = int_to_ptr.vmem [resolvable:$true] %s142_s7 }
  0x19   : > { %s2311_s11 = scalar_lea.hbm %s2856_s1, 11520 }
  0x1a   : > { %p2312_p1 = scmp.ne.s32.totalorder %s2856_s1, %s2311_s11  ;;  %p2313_p2 = pneg %p2556_p0 }
  0x1b   : > { %p2318_p6 = scmp.lt.u32.totalorder %s2311_s11, %s2856_s1 }
  0x1c   : > { %p2314_p4 = pnand %p2313_p2, %p2312_p1 }
  0x1e   : > { %p2315_p5 = pneg %p2314_p4 }
  0x20   : > { %p2320_p7 = pnand %p2318_p6, %p2315_p5 }
  0x22   : > { %2323 = shalt.err (!%p2320_p7)
}
  0x23   : > { %s2324_s28 = scalar_lea.vmem %s143_s7, 11520  ;;  %p2332_p8 = scmp.lt.s32.totalorder %s143_s7, %s143_s7 }
  0x24   : > { %p2325_p9 = scmp.ne.s32.totalorder %s143_s7, %s2324_s28  ;;  %p2333_p3 = scmp.lt.s32.totalorder %s2324_s28, %s2324_s28 }
  0x26   : > { %p2327_p11 = pnand %p2325_p9, %p2313_p2  ;;  %p2334_p12 = por %p2333_p3, %p2332_p8 }
  0x28   : > { %p2328_p13 = pneg %p2327_p11 }
  0x2a   : > { %p2335_p10 = pnand %p2334_p12, %p2328_p13 }
  0x2c   : > { %2338 = shalt.err (!%p2335_p10)
}
  0x2d   : > { %s2440_s29 = smov 64   ;;  %s2441_s6 = smov 4  }
  0x2e   : > { %2124 = dma.hbm_to_vmem [thread:$0]  (!%p2556_p0), %s2856_s1, 11520, %s143_s7, [#allocation3], %s2440_s29, %s2440_s29, %s2441_s6  }
  0x2f   : > { %p2868_p1 = scmp.ne.s32.totalorder %s2865_s30, 0 }
  0x30   : > { %p2869_p4 = scmp.ne.s32.totalorder (!%p2868_p1), %s2866_s4, 0 }
  0x31   : > { %169 = sbr.rel (%p2868_p1) target bundleno = 1098 (0x44a), region = 32 }
  0x38   : > { %2400 = dma.done.wait (%p2869_p4), [#allocation3], 11520  }
  0x39   : > { %2402 = vsyncadd (%p2869_p4), [#allocation3], 4294955776  ;;  %v2442_v0 = vmov 0   ;;  %v2209_v1 = vld [vmem:[#allocation2 + $0x50] sm:$0xff]   ;;  %v2210_v2 = vld [vmem:[#allocation2] sm:$0xff]   ;;  %p193_p3 = scmp.lt.s32.totalorder %s2425_s16, 1 }
  0x3a   : > { %336 = vmatprep.subr.bf16.mxu0 %v2442_v0  ;;  %442 = vmatprep.subr.bf16.mxu1 %v2442_v0  ;;  %v2211_v3 = vld [vmem:[#allocation2 + $0x58] sm:$0xff]   ;;  %v2212_v4 = vld [vmem:[#allocation2 + $0x8] sm:$0xff]   ;;  %v2213_v5 = vld [vmem:[#allocation2 + $0x60] sm:$0xff]   ;;  %s2112_s20 = sshll.u32 %s2421_s15, 4  ;;  %vm332_vm0 = vcmask 261120   ;;  %s2443_s28 = smov 80  }
  0x3b   : > { %337 = vmatpush1.bf16.msra.mxu0 %v2209_v1  ;;  %443 = vmatpush1.bf16.msra.mxu1 %v2210_v2  ;;  %s194_s30 = scalar_select %p193_p3, %s2425_s16, 1  ;;  %v2214_v6 = vld [vmem:[#allocation2 + $0x10] sm:$0xff]   ;;  %v2215_v7 = vld [vmem:[#allocation2 + $0x68] sm:$0xff]   ;;  %v2216_v8 = vld [vmem:[#allocation2 + $0x18] sm:$0xff]   ;;  %vm1584_vm3 = vcmask 130048   ;;  %vm1857_vm12 = vcmask 392192  }
  0x3c   : > { %338 = vmatprep.subr.bf16.mxu0 %v2442_v0  ;;  %444 = vmatprep.subr.bf16.mxu1 %v2442_v0  ;;  %v2217_v9 = vld [vmem:[#allocation2 + $0x70] sm:$0xff]   ;;  %v2218_v10 = vld [vmem:[#allocation2 + $0x20] sm:$0xff]   ;;  %v2219_v11 = vld [vmem:[#allocation2 + $0x78] sm:$0xff]   ;;  %s2444_s29 = smov 112   ;;  %s2445_s6 = smov 64   ;;  %vm1859_vm13 = vcmask 523264  }
  0x3d   : > { %s2113_s4 = smul.u32 96, %s194_s30  ;;  %v2220_v12 = vld [vmem:[#allocation2 + $0x28] sm:$0xff]   ;;  %v2221_v17 = vld [vmem:[#allocation2 + $0x80] sm:$0xff]   ;;  %v2222_v18 = vld [vmem:[#allocation2 + $0x30] sm:$0xff]   ;;  %s2446_s9 = smov 96   ;;  %vm1861_vm14 = vcmask 654336  }
  0x3e   : > { %v2223_v21 = vld [vmem:[#allocation2 + $0x88] sm:$0xff]   ;;  %v2224_v24 = vld [vmem:[#allocation2 + $0x38] sm:$0xff]   ;;  %v2225_v27 = vld [vmem:[#allocation2 + $0x90] sm:$0xff]   ;;  %s2447_s10 = smov 32   ;;  %s2448_s30 = smov 48   ;;  %vm1863_vm15 = vcmask 785408  }
  0x3f   : > { %339 = vmatpush1.bf16.msra.mxu0 %v2211_v3  ;;  %445 = vmatpush1.bf16.msra.mxu1 %v2212_v4  ;;  %s197_s11 = scalar_lea.vmem %s2855_s0, %s2113_s4  ;;  %v2226_v28 = vld [vmem:[#allocation2 + $0x40] sm:$0xff]   ;;  %v2227_v31 = vld [vmem:[#allocation2 + $0x98] sm:$0xff]   ;;  %v2228_v32 = vld [vmem:[#allocation2 + $0x48] sm:$0xff]   ;;  %s2449_s4 = smov 16  }
  0x40   : > { %340 = vmatprep.subr.bf16.mxu0 %v2442_v0  ;;  %446 = vmatprep.subr.bf16.mxu1 %v2442_v0  ;;  %s2598_s21 = scalar_lea.vmem %s197_s11, %s2112_s20  ;;  %v2233_v35 = vld [vmem:[#allocation2 + $0xa0] sm:$0xff]   ;;  %v2234_v36 = vld [vmem:[#allocation2 + $0xf0] sm:$0xff]   ;;  %v2235_v39 = vld [vmem:[#allocation2 + $0xa8] sm:$0xff]   ;;  %s190_s7 = sand.u32 1, %s2413_s13  }
  0x41   : > { %v202_v13 = vld [vmem:[%s2598_s21] sm:$0xff]  ;;  %v203_v14 = vld [vmem:[%s2598_s21 + $0x8] sm:$0x11]  ;;  %v2621_v38 = vld [vmem:[%s2598_s21 + $0x10] sm:$0xff]  ;;  %s1990_s8 = sshll.u32 %s190_s7, 3  ;;  %s2108_s11 = sshll.u32 %s2425_s16, 2 }
  0x42   : > { %v1995_v15 = vcombine.high %v202_v13, %v203_v14  ;;  %v2008_v16 = vcombine.high %v202_v13, %v202_v13  ;;  %v2607_v22 = vcombine.low %v202_v13, %v203_v14  ;;  %v2007_v34 = vcombine.low %v202_v13, %v202_v13  ;;  %v2236_v41 = vld [vmem:[#allocation2 + $0xf8] sm:$0xff]   ;;  %v2237_v42 = vld [vmem:[#allocation2 + $0xb0] sm:$0xff]   ;;  %v2238_v43 = vld [vmem:[#allocation2 + $0x100] sm:$0xff]   ;;  %s1893_s20 = sadd.s32 %s2421_s15, %s2108_s11  ;;  %s192_s24 = scalar_lea.vmem [#allocation5], %s1990_s8 }
  0x43   : > { %341 = vmatpush1.bf16.msra.mxu0 %v2213_v5  ;;  %447 = vmatpush1.bf16.msra.mxu1 %v2214_v6  ;;  %v2032_v40 = vcombine.high %v2621_v38, %v2621_v38  ;;  %v2239_v44 = vld [vmem:[#allocation2 + $0xb8] sm:$0xff]   ;;  %v2240_v45 = vld [vmem:[#allocation2 + $0x108] sm:$0xff]   ;;  %v2241_v46 = vld [vmem:[#allocation2 + $0xc0] sm:$0xff]   ;;  %v2031_v2 = vcombine.low %v2621_v38, %v2621_v38  ;;  %s1897_s25 = sshll.u32 %s192_s24, 4  ;;  %s1882_s16 = scalar_lea.sflag [#allocation4], %s190_s7  ;;  %s2804_s25 = int_to_ptr.vmem [resolvable:$true] %s1897_s25 }
  0x44   : > { %342 = vmatprep.subr.bf16.mxu0 %v2442_v0  ;;  %448 = vmatprep.subr.bf16.mxu1 %v2442_v0  ;;  %v265_v19 = vshrl.u32 %v1995_v15, 16  ;;  %v267_v20 = vshll.u32 %v1995_v15, 16  ;;  %v260_v26 = vshll.u32 %v2607_v22, 16  ;;  %v258_v29 = vshrl.u32 %v2607_v22, 16  ;;  %v2242_v47 = vld [vmem:[#allocation2 + $0x110] sm:$0xff]   ;;  %v2243_v48 = vld [vmem:[#allocation2 + $0xc8] sm:$0xff]  }
  0x45   : > { %2019 = vmatprep.mubr.msk.bf16.mxu1 %vm332_vm0, %v2008_v16  ;;  %v504_v37 = vrot.slane %v1995_v15, 1  ;;  %v2244_v49 = vld [vmem:[#allocation2 + $0x118] sm:$0xff]   ;;  %v2245_v50 = vld [vmem:[#allocation2 + $0xd0] sm:$0xff]   ;;  %v2246_v51 = vld [vmem:[#allocation2 + $0x120] sm:$0xff]   ;;  %v503_v63 = vrot.slane %v2607_v22, 1  ;;  %s2339_s15 = scalar_lea.vmem %s2804_s25, 128 }
  0x46   : > { %v269_v23 = vrot.slane %v267_v20, 1  ;;  %v262_v30 = vrot.slane %v260_v26, 1  ;;  %v2640_v52 = vld [vmem:[%s2598_s21 + $0x18] sm:$0x11]  ;;  %v2248_v54 = vld [vmem:[#allocation2 + $0x128] sm:$0xff]   ;;  %v2249_v56 = vld [vmem:[#allocation2 + $0xe0] sm:$0xff]   ;;  %p2340_p8 = scmp.ne.s32.totalorder %s2804_s25, %s2339_s15 }
  0x47   : > { %343 = vmatpush1.bf16.msra.mxu0 %v2215_v7  ;;  %449 = vmatpush1.bf16.msra.mxu1 %v2216_v8  ;;  %v2247_v53 = vld [vmem:[#allocation2 + $0xd8] sm:$0xff]   ;;  %v2045_v55 = vcombine.high %v2621_v38, %v2640_v52  ;;  %v2250_v57 = vld [vmem:[#allocation2 + $0x130] sm:$0xff]   ;;  %v2251_v59 = vld [vmem:[#allocation2 + $0xe8] sm:$0xff]   ;;  %p2870_p10 = scmp.ne.s32.totalorder %s2863_s26, 0 }
  0x48   : > { %344 = vmatprep.subr.bf16.mxu0 %v2442_v0  ;;  %450 = vmatprep.subr.bf16.mxu1 %v2442_v0  ;;  %v270_v25 = vor.u32 %v269_v23, %v265_v19  ;;  %v263_v33 = vor.u32 %v262_v30, %v258_v29  ;;  %v2252_v60 = vld [vmem:[#allocation2 + $0x138] sm:$0xff]   ;;  %v2254_v1 = vld [vmem:[#allocation2 + $0x140] sm:$0xff]   ;;  %v2256_v3 = vld [vmem:[#allocation2 + $0x190] sm:$0xff]  }
  0x49   : > { %v777_v58 = vshll.u32 %v2045_v55, 16  ;;  %v775_v61 = vshrl.u32 %v2045_v55, 16  ;;  %v908_v5 = vrot.slane %v2045_v55, 1  ;;  %v2257_v6 = vld [vmem:[#allocation2 + $0x148] sm:$0xff]   ;;  %v2258_v7 = vld [vmem:[#allocation2 + $0x198] sm:$0xff]   ;;  %v2259_v8 = vld [vmem:[#allocation2 + $0x150] sm:$0xff]   ;;  %p2341_p12 = pnand %p2340_p8, %p2870_p10 }
  0x4a   : > { %2006 = vmatprep.mubr.msk.bf16.mxu0 %vm332_vm0, %v270_v25  ;;  %v2264_v13 = vld [vmem:[#allocation2 + $0x1b0] sm:$0xff]   ;;  %v2265_v14 = vld [vmem:[#allocation2 + $0x168] sm:$0xff]   ;;  %v2266_v15 = vld [vmem:[#allocation2 + $0x1b8] sm:$0xff]  }
  0x4b   : > { %345 = vmatpush1.bf16.msra.mxu0 %v2217_v9  ;;  %451 = vmatpush1.bf16.msra.mxu1 %v2218_v10  ;;  %v779_v62 = vrot.slane %v777_v58, 1  ;;  %v2260_v9 = vld [vmem:[#allocation2 + $0x1a0] sm:$0xff]   ;;  %v2261_v10 = vld [vmem:[#allocation2 + $0x158] sm:$0xff]   ;;  %v2267_v16 = vld [vmem:[#allocation2 + $0x170] sm:$0xff]   ;;  %p2342_p0 = pneg %p2341_p12 }
  0x4c   : > { %346 = vmatprep.subr.bf16.mxu0 %v2442_v0  ;;  %452 = vmatprep.subr.bf16.mxu1 %v2442_v0  ;;  %v2269_v19 = vld [vmem:[#allocation2 + $0x178] sm:$0xff]   ;;  %v2672_v20 = vld [vmem:[%s2598_s21 + $0x20] sm:$0xff]  ;;  %v2270_v22 = vld [vmem:[#allocation2 + $0x1c8] sm:$0xff]  }
  0x4d   : > { %v780_v4 = vor.u32 %v779_v62, %v775_v61  ;;  %v2271_v25 = vld [vmem:[#allocation2 + $0x180] sm:$0xff]   ;;  %v2272_v26 = vld [vmem:[#allocation2 + $0x1d0] sm:$0xff]   ;;  %v2273_v30 = vld [vmem:[#allocation2 + $0x188] sm:$0xff]   ;;  %v2068_v62 = vcombine.low %v2672_v20, %v2672_v20 }
  0x4e   : > { %v2293_v55 = vld [vmem:[#allocation2 + $0x220] sm:$0xff]   ;;  %v2295_v58 = vld [vmem:[#allocation2 + $0x228] sm:$0xff]   ;;  %v2297_v61 = vld [vmem:[#allocation2 + $0x278] sm:$0xff]  }
  0x4f   : > { %347 = vmatpush1.bf16.msra.mxu0 %v2219_v11  ;;  %453 = vmatpush1.bf16.msra.mxu1 %v2220_v12  ;;  %v2262_v11 = vld [vmem:[#allocation2 + $0x1a8] sm:$0xff]   ;;  %v2263_v12 = vld [vmem:[#allocation2 + $0x160] sm:$0xff]  }
  0x50   : > { %348 = vmatprep.subr.bf16.mxu0 %v2442_v0  ;;  %454 = vmatprep.subr.bf16.mxu1 %v2442_v0 }
  0x53   : > { %349 = vmatpush1.bf16.msra.mxu0 %v2221_v17  ;;  %455 = vmatpush1.bf16.msra.mxu1 %v2222_v18  ;;  %v2268_v17 = vld [vmem:[#allocation2 + $0x1c0] sm:$0xff]   ;;  %v2044_v18 = vcombine.low %v2621_v38, %v2640_v52  ;;  %v2069_v38 = vcombine.high %v2672_v20, %v2672_v20  ;;  %v2291_v52 = vld [vmem:[#allocation2 + $0x218] sm:$0xff]  }
  0x54   : > { %350 = vmatprep.subr.bf16.mxu0 %v2442_v0  ;;  %456 = vmatprep.subr.bf16.mxu1 %v2442_v0 }
  0x55   : > { %v770_v23 = vshll.u32 %v2044_v18, 16 }
  0x57   : > { %351 = vmatpush1.bf16.msra.mxu0 %v2223_v21  ;;  %457 = vmatpush1.bf16.msra.mxu1 %v2224_v24  ;;  %v2675_v21 = vld [vmem:[%s2598_s21 + $0x28] sm:$0x11]  ;;  %s2109_s21 = sshll.u32 %s1893_s20, 7 }
  0x58   : > { %352 = vmatprep.subr.bf16.mxu0 %v2442_v0  ;;  %458 = vmatprep.subr.bf16.mxu1 %v2442_v0  ;;  %v2681_v24 = vcombine.high %v2672_v20, %v2675_v21 }
  0x5a   : > { %v1181_v29 = vshll.u32 %v2681_v24, 16 }
  0x5b   : > { %353 = vmatpush1.bf16.msra.mxu0 %v2225_v27  ;;  %459 = vmatpush1.bf16.msra.mxu1 %v2226_v28  ;;  %v768_v27 = vshrl.u32 %v2044_v18, 16  ;;  %v772_v28 = vrot.slane %v770_v23, 1 }
  0x5c   : > { %354 = vmatprep.subr.bf16.mxu0 %v2442_v0  ;;  %460 = vmatprep.subr.bf16.mxu1 %v2442_v0 }
  0x5f   : > { %355 = vmatpush1.bf16.msra.mxu0 %v2227_v31  ;;  %461 = vmatpush1.bf16.msra.mxu1 %v2228_v32  ;;  %v2275_v31 = vld [vmem:[#allocation2 + $0x1d8] sm:$0xff]   ;;  %v773_v32 = vor.u32 %v772_v28, %v768_v27 }
  0x60   : > { %569 = vmatprep.subr.bf16.mxu0 %v2442_v0  ;;  %700 = vmatprep.subr.bf16.mxu1 %v2442_v0 }
  0x62   : > { %369 = vmatmul.mubr.bf16.vlgmr.msra.gmra.mrb[0].mxu0 %v263_v33  ;;  %475 = vmatmul.mubr.bf16.vlgmr.msra.gmra.mrb[0].mxu1 %v2007_v34  ;;  %v1179_v33 = vshrl.u32 %v2681_v24, 16  ;;  %v1183_v34 = vrot.slane %v1181_v29, 1 }
  0x63   : > { %570 = vmatpush1.bf16.msra.mxu0 %v2233_v35  ;;  %701 = vmatpush1.bf16.msra.mxu1 %v2234_v36  ;;  %v2277_v35 = vld [vmem:[#allocation2 + $0x1e0] sm:$0xff]   ;;  %v907_v36 = vrot.slane %v2044_v18, 1 }
  0x64   : > { %571 = vmatprep.subr.bf16.mxu0 %v2442_v0  ;;  %702 = vmatprep.subr.bf16.mxu1 %v2442_v0 }
  0x65   : > { %2030 = vmatprep.mubr.msk.bf16.mxu0 %vm332_vm0, %v504_v37  ;;  %2043 = vmatprep.mubr.msk.bf16.mxu1 %vm332_vm0, %v2032_v40  ;;  %v2278_v37 = vld [vmem:[#allocation2 + $0x230] sm:$0xff]   ;;  %v2279_v40 = vld [vmem:[#allocation2 + $0x1e8] sm:$0xff]  }
  0x67   : > { %572 = vmatpush1.bf16.msra.mxu0 %v2235_v39  ;;  %703 = vmatpush1.bf16.msra.mxu1 %v2236_v41  ;;  %v1184_v39 = vor.u32 %v1183_v34, %v1179_v33  ;;  %v2280_v41 = vld [vmem:[#allocation2 + $0x238] sm:$0xff]  }
  0x68   : > { %573 = vmatprep.subr.bf16.mxu0 %v2442_v0  ;;  %704 = vmatprep.subr.bf16.mxu1 %v2442_v0 }
  0x6b   : > { %574 = vmatpush1.bf16.msra.mxu0 %v2237_v42  ;;  %705 = vmatpush1.bf16.msra.mxu1 %v2238_v43  ;;  %v2281_v42 = vld [vmem:[#allocation2 + $0x1f0] sm:$0xff]   ;;  %v2282_v43 = vld [vmem:[#allocation2 + $0x240] sm:$0xff]  }
  0x6c   : > { %575 = vmatprep.subr.bf16.mxu0 %v2442_v0  ;;  %706 = vmatprep.subr.bf16.mxu1 %v2442_v0 }
  0x6f   : > { %576 = vmatpush1.bf16.msra.mxu0 %v2239_v44  ;;  %707 = vmatpush1.bf16.msra.mxu1 %v2240_v45  ;;  %v2283_v44 = vld [vmem:[#allocation2 + $0x1f8] sm:$0xff]   ;;  %v2284_v45 = vld [vmem:[#allocation2 + $0x248] sm:$0xff]  }
  0x70   : > { %577 = vmatprep.subr.bf16.mxu0 %v2442_v0  ;;  %708 = vmatprep.subr.bf16.mxu1 %v2442_v0 }
  0x73   : > { %578 = vmatpush1.bf16.msra.mxu0 %v2241_v46  ;;  %709 = vmatpush1.bf16.msra.mxu1 %v2242_v47  ;;  %v2285_v46 = vld [vmem:[#allocation2 + $0x200] sm:$0xff]   ;;  %v2286_v47 = vld [vmem:[#allocation2 + $0x250] sm:$0xff]  }
  0x74   : > { %579 = vmatprep.subr.bf16.mxu0 %v2442_v0  ;;  %710 = vmatprep.subr.bf16.mxu1 %v2442_v0 }
  0x77   : > { %580 = vmatpush1.bf16.msra.mxu0 %v2243_v48  ;;  %711 = vmatpush1.bf16.msra.mxu1 %v2244_v49  ;;  %v2287_v48 = vld [vmem:[#allocation2 + $0x208] sm:$0xff]   ;;  %v2288_v49 = vld [vmem:[#allocation2 + $0x258] sm:$0xff]  }
  0x78   : > { %581 = vmatprep.subr.bf16.mxu0 %v2442_v0  ;;  %712 = vmatprep.subr.bf16.mxu1 %v2442_v0 }
  0x7b   : > { %582 = vmatpush1.bf16.msra.mxu0 %v2245_v50  ;;  %713 = vmatpush1.bf16.msra.mxu1 %v2246_v51  ;;  %v2289_v50 = vld [vmem:[#allocation2 + $0x210] sm:$0xff]   ;;  %v2290_v51 = vld [vmem:[#allocation2 + $0x260] sm:$0xff]  }
  0x7c   : > { %583 = vmatprep.subr.bf16.mxu0 %v2442_v0  ;;  %714 = vmatprep.subr.bf16.mxu1 %v2442_v0 }
  0x7f   : > { %584 = vmatpush1.bf16.msra.mxu0 %v2247_v53  ;;  %715 = vmatpush1.bf16.msra.mxu1 %v2248_v54  ;;  %v2081_v53 = vcombine.low %v2672_v20, %v2675_v21  ;;  %v2292_v54 = vld [vmem:[#allocation2 + $0x268] sm:$0xff]  }
  0x80   : > { %585 = vmatprep.subr.bf16.mxu0 %v2442_v0  ;;  %716 = vmatprep.subr.bf16.mxu1 %v2442_v0 }
  0x83   : > { %586 = vmatpush1.bf16.msra.mxu0 %v2249_v56  ;;  %717 = vmatpush1.bf16.msra.mxu1 %v2250_v57  ;;  %v1174_v56 = vshll.u32 %v2081_v53, 16  ;;  %v2294_v57 = vld [vmem:[#allocation2 + $0x270] sm:$0xff]  }
  0x84   : > { %587 = vmatprep.subr.bf16.mxu0 %v2442_v0  ;;  %718 = vmatprep.subr.bf16.mxu1 %v2442_v0 }
  0x87   : > { %588 = vmatpush1.bf16.msra.mxu0 %v2251_v59  ;;  %719 = vmatpush1.bf16.msra.mxu1 %v2252_v60  ;;  %v1172_v59 = vshrl.u32 %v2081_v53, 16  ;;  %v1176_v60 = vrot.slane %v1174_v56, 1 }
  0x88   : > { %845 = vmatprep.subr.bf16.mxu0 %v2442_v0  ;;  %973 = vmatprep.subr.bf16.mxu1 %v2442_v0 }
  0x8a   : > { %602 = vmatmul.mubr.bf16.vlgmr.msra.gmra.mrb[4].mxu0 %v503_v63  ;;  %733 = vmatmul.mubr.bf16.vlgmr.msra.gmra.mrb[4].mxu1 %v2031_v2  ;;  %v2300_v63 = vld [vmem:[#allocation2 + $0x280] sm:$0xff]   ;;  %v1312_v2 = vrot.slane %v2681_v24, 1 }
  0x8b   : > { %846 = vmatpush1.bf16.msra.mxu0 %v2254_v1  ;;  %974 = vmatpush1.bf16.msra.mxu1 %v2256_v3  ;;  %v1177_v1 = vor.u32 %v1176_v60, %v1172_v59  ;;  %v2302_v3 = vld [vmem:[#allocation2 + $0x288] sm:$0xff]  }
  0x8c   : > { %847 = vmatprep.subr.bf16.mxu0 %v2442_v0  ;;  %975 = vmatprep.subr.bf16.mxu1 %v2442_v0 }
  0x8d   : > { %2056 = vmatprep.mubr.msk.bf16.mxu0 %vm332_vm0, %v780_v4  ;;  %2067 = vmatprep.mubr.msk.bf16.mxu1 %vm332_vm0, %v908_v5  ;;  %v2303_v4 = vld [vmem:[#allocation2 + $0x290] sm:$0xff]   ;;  %v2304_v5 = vld [vmem:[#allocation2 + $0x298] sm:$0xff]  }
  0x8f   : > { %848 = vmatpush1.bf16.msra.mxu0 %v2257_v6  ;;  %976 = vmatpush1.bf16.msra.mxu1 %v2258_v7  ;;  %v2305_v6 = vld [vmem:[#allocation2 + $0x2a0] sm:$0xff]   ;;  %v2306_v7 = vld [vmem:[#allocation2 + $0x2a8] sm:$0xff]  }
  0x90   : > { %849 = vmatprep.subr.bf16.mxu0 %v2442_v0  ;;  %977 = vmatprep.subr.bf16.mxu1 %v2442_v0 }
  0x93   : > { %850 = vmatpush1.bf16.msra.mxu0 %v2259_v8  ;;  %978 = vmatpush1.bf16.msra.mxu1 %v2260_v9  ;;  %v2307_v8 = vld [vmem:[#allocation2 + $0x2b0] sm:$0xff]   ;;  %v2308_v9 = vld [vmem:[#allocation2 + $0x2b8] sm:$0xff]  }
  0x94   : > { %851 = vmatprep.subr.bf16.mxu0 %v2442_v0  ;;  %979 = vmatprep.subr.bf16.mxu1 %v2442_v0 }
  0x97   : > { %852 = vmatpush1.bf16.msra.mxu0 %v2261_v10  ;;  %980 = vmatpush1.bf16.msra.mxu1 %v2262_v11  ;;  %v2309_v10 = vld [vmem:[#allocation2 + $0x2c0] sm:$0xff]   ;;  %v2310_v11 = vld [vmem:[#allocation2 + $0x2c8] sm:$0xff]  }
  0x98   : > { %853 = vmatprep.subr.bf16.mxu0 %v2442_v0  ;;  %981 = vmatprep.subr.bf16.mxu1 %v2442_v0 }
  0x9b   : > { %854 = vmatpush1.bf16.msra.mxu0 %v2263_v12  ;;  %982 = vmatpush1.bf16.msra.mxu1 %v2264_v13  ;;  %v1311_v12 = vrot.slane %v2081_v53, 1 }
  0x9c   : > { %855 = vmatprep.subr.bf16.mxu0 %v2442_v0  ;;  %983 = vmatprep.subr.bf16.mxu1 %v2442_v0 }
  0x9f   : > { %856 = vmatpush1.bf16.msra.mxu0 %v2265_v14  ;;  %984 = vmatpush1.bf16.msra.mxu1 %v2266_v15 }
  0xa0   : > { %857 = vmatprep.subr.bf16.mxu0 %v2442_v0  ;;  %985 = vmatprep.subr.bf16.mxu1 %v2442_v0 }
  0xa3   : > { %858 = vmatpush1.bf16.msra.mxu0 %v2267_v16  ;;  %986 = vmatpush1.bf16.msra.mxu1 %v2268_v17 }
  0xa4   : > { %859 = vmatprep.subr.bf16.mxu0 %v2442_v0  ;;  %987 = vmatprep.subr.bf16.mxu1 %v2442_v0 }
  0xa7   : > { %860 = vmatpush1.bf16.msra.mxu0 %v2269_v19  ;;  %988 = vmatpush1.bf16.msra.mxu1 %v2270_v22 }
  0xa8   : > { %861 = vmatprep.subr.bf16.mxu0 %v2442_v0  ;;  %989 = vmatprep.subr.bf16.mxu1 %v2442_v0 }
  0xab   : > { %862 = vmatpush1.bf16.msra.mxu0 %v2271_v25  ;;  %990 = vmatpush1.bf16.msra.mxu1 %v2272_v26 }
  0xac   : > { %863 = vmatprep.subr.bf16.mxu0 %v2442_v0  ;;  %991 = vmatprep.subr.bf16.mxu1 %v2442_v0 }
  0xaf   : > { %864 = vmatpush1.bf16.msra.mxu0 %v2273_v30  ;;  %992 = vmatpush1.bf16.msra.mxu1 %v2275_v31 }
  0xb0   : > { %1104 = vmatprep.subr.bf16.mxu0 %v2442_v0  ;;  %1249 = vmatprep.subr.bf16.mxu1 %v2442_v0 }
  0xb2   : > { %878 = vmatmul.mubr.bf16.vlgmr.msra.gmra.mrb[8].mxu0 %v773_v32  ;;  %1006 = vmatmul.mubr.bf16.vlgmr.msra.gmra.mrb[8].mxu1 %v907_v36 }
  0xb3   : > { %1105 = vmatpush1.bf16.msra.mxu0 %v2277_v35  ;;  %1250 = vmatpush1.bf16.msra.mxu1 %v2278_v37 }
  0xb4   : > { %1106 = vmatprep.subr.bf16.mxu0 %v2442_v0  ;;  %1251 = vmatprep.subr.bf16.mxu1 %v2442_v0 }
  0xb5   : > { %2080 = vmatprep.mubr.msk.bf16.mxu0 %vm332_vm0, %v2069_v38  ;;  %2093 = vmatprep.mubr.msk.bf16.mxu1 %vm332_vm0, %v1184_v39 }
  0xb7   : > { %1107 = vmatpush1.bf16.msra.mxu0 %v2279_v40  ;;  %1252 = vmatpush1.bf16.msra.mxu1 %v2280_v41 }
  0xb8   : > { %1108 = vmatprep.subr.bf16.mxu0 %v2442_v0  ;;  %1253 = vmatprep.subr.bf16.mxu1 %v2442_v0 }
  0xbb   : > { %1109 = vmatpush1.bf16.msra.mxu0 %v2281_v42  ;;  %1254 = vmatpush1.bf16.msra.mxu1 %v2282_v43 }
  0xbc   : > { %1110 = vmatprep.subr.bf16.mxu0 %v2442_v0  ;;  %1255 = vmatprep.subr.bf16.mxu1 %v2442_v0 }
  0xbf   : > { %1111 = vmatpush1.bf16.msra.mxu0 %v2283_v44  ;;  %1256 = vmatpush1.bf16.msra.mxu1 %v2284_v45 }
  0xc0   : > { %1112 = vmatprep.subr.bf16.mxu0 %v2442_v0  ;;  %1257 = vmatprep.subr.bf16.mxu1 %v2442_v0 }
  0xc3   : > { %1113 = vmatpush1.bf16.msra.mxu0 %v2285_v46  ;;  %1258 = vmatpush1.bf16.msra.mxu1 %v2286_v47 }
  0xc4   : > { %1114 = vmatprep.subr.bf16.mxu0 %v2442_v0  ;;  %1259 = vmatprep.subr.bf16.mxu1 %v2442_v0 }
  0xc7   : > { %1115 = vmatpush1.bf16.msra.mxu0 %v2287_v48  ;;  %1260 = vmatpush1.bf16.msra.mxu1 %v2288_v49 }
  0xc8   : > { %1116 = vmatprep.subr.bf16.mxu0 %v2442_v0  ;;  %1261 = vmatprep.subr.bf16.mxu1 %v2442_v0 }
  0xcb   : > { %1117 = vmatpush1.bf16.msra.mxu0 %v2289_v50  ;;  %1262 = vmatpush1.bf16.msra.mxu1 %v2290_v51 }
  0xcc   : > { %1118 = vmatprep.subr.bf16.mxu0 %v2442_v0  ;;  %1263 = vmatprep.subr.bf16.mxu1 %v2442_v0 }
  0xcf   : > { %1119 = vmatpush1.bf16.msra.mxu0 %v2291_v52  ;;  %1264 = vmatpush1.bf16.msra.mxu1 %v2292_v54  ;;  %v2105_v52 = vld [vmem:[%s2857_s2] ss:$0 sm:$0xff] }
  0xd0   : > { %1120 = vmatprep.subr.bf16.mxu0 %v2442_v0  ;;  %1265 = vmatprep.subr.bf16.mxu1 %v2442_v0 }
  0xd3   : > { %1121 = vmatpush1.bf16.msra.mxu0 %v2293_v55  ;;  %1266 = vmatpush1.bf16.msra.mxu1 %v2294_v57 }
  0xd4   : > { %1122 = vmatprep.subr.bf16.mxu0 %v2442_v0  ;;  %1267 = vmatprep.subr.bf16.mxu1 %v2442_v0 }
  0xd7   : > { %1123 = vmatpush1.bf16.msra.mxu0 %v2295_v58  ;;  %1268 = vmatpush1.bf16.msra.mxu1 %v2297_v61 }
  0xd8   : > { %1377 = vmatprep.subr.bf16.mxu0 %v2442_v0 }
  0xda   : > { %1137 = vmatmul.mubr.bf16.vlgmr.msra.gmra.mrb[12].mxu0 %v2068_v62  ;;  %1282 = vmatmul.mubr.bf16.vlgmr.msra.gmra.mrb[12].mxu1 %v1177_v1  ;;  %v2450_v1 = vmov 1983009808  }
  0xdb   : > { %1378 = vmatpush1.bf16.msra.mxu0 %v2300_v63  ;;  %2104 = vmatprep.mubr.msk.bf16.mxu0 %vm332_vm0, %v1312_v2  ;;  %v1451_v2 = vunpack.c.l.s4 %v2450_v1 }
  0xdc   : > { %1379 = vmatprep.subr.bf16.mxu0 %v2442_v0 }
  0xdf   : > { %1380 = vmatpush1.bf16.msra.mxu0 %v2302_v3  ;;  %v1453_v3 = vlaneseq }
  0xe0   : > { %1381 = vmatprep.subr.bf16.mxu0 %v2442_v0 }
  0xe3   : > { %1382 = vmatpush1.bf16.msra.mxu0 %v2303_v4 }
  0xe4   : > { %1383 = vmatprep.subr.bf16.mxu0 %v2442_v0 }
  0xe7   : > { %1384 = vmatpush1.bf16.msra.mxu0 %v2304_v5  ;;  %v1452_v5 = vunpack.c.0.s8 %v1451_v2 }
  0xe8   : > { %1385 = vmatprep.subr.bf16.mxu0 %v2442_v0 }
  0xeb   : > { %1386 = vmatpush1.bf16.msra.mxu0 %v2305_v6  ;;  %v1454_v6 = vshrl.u32 %v1453_v3, 7 }
  0xec   : > { %1387 = vmatprep.subr.bf16.mxu0 %v2442_v0 }
  0xef   : > { %1388 = vmatpush1.bf16.msra.mxu0 %v2306_v7 }
  0xf0   : > { %1389 = vmatprep.subr.bf16.mxu0 %v2442_v0 }
  0xf3   : > { %1390 = vmatpush1.bf16.msra.mxu0 %v2307_v8 }
  0xf4   : > { %1391 = vmatprep.subr.bf16.mxu0 %v2442_v0 }
  0xf7   : > { %1392 = vmatpush1.bf16.msra.mxu0 %v2308_v9 }
  0xf8   : > { %1393 = vmatprep.subr.bf16.mxu0 %v2442_v0 }
  0xfb   : > { %1394 = vmatpush1.bf16.msra.mxu0 %v2309_v10  ;;  %v2451_v10 = vmov 1934713408  }
  0xfc   : > { %1395 = vmatprep.subr.bf16.mxu0 %v2442_v0 }
  0xff   : > { %1396 = vmatpush1.bf16.msra.mxu0 %v2310_v11  ;;  %v1515_v11 = vunpack.c.l.s4 %v2451_v10 }
 0x102   : > { %1410 = vmatmul.mubr.bf16.vlgmr.msra.gmra.mrb[16].mxu0 %v1311_v12  ;;  %v2742_v12 = vsub.s32 %v1452_v5, %v1454_v6 }
 0x135   : > { %v370_v13 = vpop.f32.mrb[0].mxu0  ;;  %v476_v15 = vpop.f32.mrb[0].mxu1 }
 0x136   : > { %v372_v14 = vpop.f32.mrb[1].mxu0  ;;  %v477_v16 = vadd.f32 %v476_v15, %v370_v13  ;;  %v478_v18 = vpop.f32.mrb[1].mxu1 }
 0x137   : > { %v373_v17 = vpop.f32.mrb[2].mxu0  ;;  %v479_v20 = vpop.f32.mrb[2].mxu1 }
 0x138   : > { %v374_v19 = vpop.f32.mrb[3].mxu0  ;;  %v480_v21 = vpop.f32.mrb[3].mxu1 }
 0x139   : > { %v1516_v19 = vunpack.c.0.s8 %v1515_v11 }
 0x15d   : > { %v603_v22 = vpop.f32.mrb[4].mxu0  ;;  %v734_v25 = vpop.f32.mrb[4].mxu1 }
 0x15e   : > { %v609_v23 = vadd.f32 %v603_v22, %v477_v16  ;;  %v605_v24 = vpop.f32.mrb[5].mxu0  ;;  %v736_v27 = vpop.f32.mrb[5].mxu1 }
 0x15f   : > { %v606_v26 = vpop.f32.mrb[6].mxu0  ;;  %v737_v29 = vpop.f32.mrb[6].mxu1 }
 0x160   : > { %v740_v28 = vadd.f32 %v734_v25, %v609_v23  ;;  %v607_v0 = vpop.f32.mrb[7].mxu0  ;;  %v738_v30 = vpop.f32.mrb[7].mxu1  ;;  %v2748_v29 = vsub.s32 %v1516_v19, %v1454_v6 }
 0x185   : > { %v879_v31 = vpop.f32.mrb[8].mxu0  ;;  %v1007_v34 = vpop.f32.mrb[8].mxu1 }
 0x186   : > { %v885_v32 = vadd.f32 %v879_v31, %v740_v28  ;;  %v881_v33 = vpop.f32.mrb[9].mxu0  ;;  %v1009_v36 = vpop.f32.mrb[9].mxu1 }
 0x187   : > { %v882_v35 = vpop.f32.mrb[10].mxu0  ;;  %v1010_v39 = vpop.f32.mrb[10].mxu1 }
 0x188   : > { %v1013_v37 = vadd.f32 %v1007_v34, %v885_v32  ;;  %v883_v38 = vpop.f32.mrb[11].mxu0  ;;  %v1011_v40 = vpop.f32.mrb[11].mxu1 }
 0x1ad   : > { %v1138_v41 = vpop.f32.mrb[12].mxu0  ;;  %v1283_v44 = vpop.f32.mrb[12].mxu1 }
 0x1ae   : > { %v1144_v42 = vadd.f32 %v1138_v41, %v1013_v37  ;;  %v1140_v43 = vpop.f32.mrb[13].mxu0  ;;  %v1285_v46 = vpop.f32.mrb[13].mxu1 }
 0x1af   : > { %v1141_v45 = vpop.f32.mrb[14].mxu0  ;;  %v1286_v49 = vpop.f32.mrb[14].mxu1 }
 0x1b0   : > { %v1289_v47 = vadd.f32 %v1283_v44, %v1144_v42  ;;  %v1142_v48 = vpop.f32.mrb[15].mxu0  ;;  %v1287_v50 = vpop.f32.mrb[15].mxu1 }
 0x1d5   : > { %v1411_v51 = vpop.f32.mrb[16].mxu0 }
 0x1d6   : > { %v1417_v53 = vadd.f32 %v1411_v51, %v1289_v47  ;;  %v1413_v54 = vpop.f32.mrb[17].mxu0 }
 0x1d7   : > { %v1414_v55 = vpop.f32.mrb[18].mxu0 }
 0x1d8   : > { %v2732_v56 = vadd.f32 %v2105_v52, %v1417_v53  ;;  %v1415_v57 = vpop.f32.mrb[19].mxu0 }
 0x1da   : > { %v1426_v58 = vand.u32 2147483647, %v2732_v56 }
 0x1dc   : > { %v1428_v59 = vshra.s32 %v1426_v58, 23 }
 0x1de   : > { %v2106_v60 = vadd.s32 4294967169, %v1428_v59 }
 0x1e0   : > { %vm1430_vm1 = vcmp.gt.s32.totalorder %v2106_v60, 4294967288 }
 0x1e1   : > { %v1431_v61 = vsel %vm1430_vm1, %v2106_v60, 4294967288  ;;  %vm1865_vm1 = vcmask 916480  }
 0x1e2   : > { %vm1432_vm2 = vcmp.lt.s32.totalorder %v1431_v61, 7 }
 0x1e3   : > { %v1433_v62 = vsel %vm1432_vm2, %v1431_v61, 7 }
 0x1e4   : > { %1438 = vrot.lane.b32.xlu1 %v1433_v62, %s2443_s28  ;;  %1434 = vrot.lane.b32.xlu0 %v1433_v62, %s2444_s29 }
 0x1e8   : > { %1440 = vrot.lane.b32.xlu1 %v1433_v62, %s2445_s6  ;;  %1436 = vrot.lane.b32.xlu0 %v1433_v62, %s2446_s9 }
 0x1ec   : > { %1444 = vrot.lane.b32.xlu1 %v1433_v62, %s2447_s10  ;;  %1442 = vrot.lane.b32.xlu0 %v1433_v62, %s2448_s30 }
 0x1f0   : > { %1446 = vrot.lane.b32.xlu0 %v1433_v62, %s2449_s4 }
 0x256   : > { %v1439_v63 = vpop.permute.xlu1 %1438  ;;  %v1435_v4 = vpop.permute.xlu0 %1434 }
 0x257   : > { %v1464_v13 = vcombine.low %v1435_v4, %v1439_v63  ;;  %v1465_v17 = vcombine.high %v1435_v4, %v1439_v63 }
 0x259   : > { %v1472_v22 = vrot.slane %v1464_v13, %v2742_v12  ;;  %v1479_v27 = vrot.slane %v1465_v17, %v2742_v12 }
 0x25a   : > { %v1441_v7 = vpop.permute.xlu1 %1440  ;;  %v1437_v8 = vpop.permute.xlu0 %1436 }
 0x25b   : > { %v1448_v9 = vcombine.low %v1433_v62, %v1437_v8  ;;  %v1449_v14 = vcombine.high %v1433_v62, %v1437_v8 }
 0x25d   : > { %v1456_v18 = vrot.slane %v1448_v9, %v2742_v12  ;;  %v1463_v23 = vrot.slane %v1449_v14, %v2742_v12 }
 0x25e   : > { %v1445_v15 = vpop.permute.xlu1 %1444  ;;  %v1443_v16 = vpop.permute.xlu0 %1442 }
 0x25f   : > { %v1480_v20 = vcombine.low %v1441_v7, %v1445_v15  ;;  %v1481_v21 = vcombine.high %v1441_v7, %v1445_v15  ;;  %v1512_v28 = vcombine.low %v1456_v18, %v1472_v22  ;;  %v1513_v0 = vcombine.high %v1456_v18, %v1472_v22 }
 0x260   : > { %v1528_v34 = vcombine.low %v1463_v23, %v1479_v27  ;;  %v1529_v44 = vcombine.high %v1463_v23, %v1479_v27 }
 0x261   : > { %v1488_v30 = vrot.slane %v1480_v20, %v2742_v12  ;;  %v1495_v31 = vrot.slane %v1481_v21, %v2742_v12  ;;  %v1520_v39 = vrot.slane %v1512_v28, %v2748_v29  ;;  %v1527_v41 = vrot.slane %v1513_v0, %v2748_v29 }
 0x262   : > { %v1447_v24 = vpop.permute.xlu0 %1446  ;;  %v1536_v45 = vrot.slane %v1528_v34, %v2748_v29  ;;  %v1543_v60 = vrot.slane %v1529_v44, %v2748_v29 }
 0x263   : > { %v1496_v25 = vcombine.low %v1443_v16, %v1447_v24  ;;  %v1497_v26 = vcombine.high %v1443_v16, %v1447_v24 }
 0x265   : > { %v1504_v32 = vrot.slane %v1496_v25, %v2742_v12  ;;  %v1511_v33 = vrot.slane %v1497_v26, %v2742_v12 }
 0x267   : > { %v1544_v35 = vcombine.low %v1488_v30, %v1504_v32  ;;  %v1545_v36 = vcombine.high %v1488_v30, %v1504_v32  ;;  %v1560_v37 = vcombine.low %v1495_v31, %v1511_v33  ;;  %v1561_v38 = vcombine.high %v1495_v31, %v1511_v33 }
 0x269   : > { %v1552_v40 = vrot.slane %v1544_v35, %v2748_v29  ;;  %v1559_v42 = vrot.slane %v1545_v36, %v2748_v29  ;;  %v1568_v43 = vrot.slane %v1560_v37, %v2748_v29  ;;  %v1575_v52 = vrot.slane %v1561_v38, %v2748_v29 }
 0x26b   : > { %v1577_v46 = vcombine.high %v1520_v39, %v1552_v40  ;;  %v1576_v47 = vcombine.low %v1520_v39, %v1552_v40  ;;  %v1578_v48 = vcombine.low %v1527_v41, %v1559_v42  ;;  %v1579_v49 = vcombine.high %v1527_v41, %v1559_v42 }
 0x26c   : > { %v1580_v50 = vcombine.low %v1536_v45, %v1568_v43  ;;  %v1581_v51 = vcombine.high %v1536_v45, %v1568_v43  ;;  %v1582_v4 = vcombine.low %v1543_v60, %v1575_v52  ;;  %v1583_v5 = vcombine.high %v1543_v60, %v1575_v52 }
 0x26d   : > { %v1600_v53 = vsel %vm1584_vm3, %v1577_v46, 2147483648  ;;  %v1585_v54 = vsel %vm1584_vm3, %v1576_v47, 2147483648  ;;  %v1615_v55 = vsel %vm1584_vm3, %v1578_v48, 2147483648  ;;  %v1630_v57 = vsel %vm1584_vm3, %v1579_v49, 2147483648 }
 0x26e   : > { %v1602_v58 = vshra.s32 %v1600_v53, 16  ;;  %v1587_v59 = vshra.s32 %v1585_v54, 16  ;;  %v1617_v63 = vshra.s32 %v1615_v55, 16  ;;  %v1632_v1 = vshra.s32 %v1630_v57, 16 }
 0x26f   : > { %v1645_v2 = vsel %vm1584_vm3, %v1580_v50, 2147483648  ;;  %v1660_v3 = vsel %vm1584_vm3, %v1581_v51, 2147483648  ;;  %v1675_v10 = vsel %vm1584_vm3, %v1582_v4, 2147483648  ;;  %v1690_v11 = vsel %vm1584_vm3, %v1583_v5, 2147483648 }
 0x270   : > { %v1604_v61 = vcvt.s32.f32 %v1602_v58  ;;  %v1589_v62 = vcvt.s32.f32 %v1587_v59  ;;  %v1619_v6 = vcvt.s32.f32 %v1617_v63  ;;  %v1634_v7 = vcvt.s32.f32 %v1632_v1 }
 0x271   : > { %v1647_v8 = vshra.s32 %v1645_v2, 16  ;;  %v1662_v9 = vshra.s32 %v1660_v3, 16  ;;  %v1677_v15 = vshra.s32 %v1675_v10, 16  ;;  %v1692_v16 = vshra.s32 %v1690_v11, 16 }
 0x272   : > { %1605 = vmax.xlane.f32.xlu0 %v1604_v61  ;;  %1590 = vmax.xlane.f32.xlu1 %v1589_v62  ;;  %v1601_v19 = vand.u32 65535, %v1600_v53  ;;  %v1586_v20 = vand.u32 65535, %v1585_v54  ;;  %v1631_v25 = vand.u32 65535, %v1630_v57  ;;  %v1616_v26 = vand.u32 65535, %v1615_v55 }
 0x273   : > { %v1649_v13 = vcvt.s32.f32 %v1647_v8  ;;  %v1664_v14 = vcvt.s32.f32 %v1662_v9  ;;  %v1679_v17 = vcvt.s32.f32 %v1677_v15  ;;  %v1694_v18 = vcvt.s32.f32 %v1692_v16 }
 0x274   : > { %v1603_v23 = vcvt.s32.f32 %v1601_v19  ;;  %v1588_v24 = vcvt.s32.f32 %v1586_v20  ;;  %v1633_v31 = vcvt.s32.f32 %v1631_v25  ;;  %v1618_v32 = vcvt.s32.f32 %v1616_v26 }
 0x275   : > { %v1661_v33 = vand.u32 65535, %v1660_v3  ;;  %v1646_v34 = vand.u32 65535, %v1645_v2  ;;  %v1691_v41 = vand.u32 65535, %v1690_v11  ;;  %v1676_v42 = vand.u32 65535, %v1675_v10 }
 0x276   : > { %1620 = vmax.xlane.f32.xlu0 %v1619_v6  ;;  %1635 = vmax.xlane.f32.xlu1 %v1634_v7 }
 0x277   : > { %v1663_v39 = vcvt.s32.f32 %v1661_v33  ;;  %v1648_v40 = vcvt.s32.f32 %v1646_v34  ;;  %v1693_v47 = vcvt.s32.f32 %v1691_v41  ;;  %v1678_v48 = vcvt.s32.f32 %v1676_v42 }
 0x27a   : > { %1650 = vmax.xlane.f32.xlu0 %v1649_v13  ;;  %1665 = vmax.xlane.f32.xlu1 %v1664_v14 }
 0x27e   : > { %1680 = vmax.xlane.f32.xlu0 %v1679_v17  ;;  %1695 = vmax.xlane.f32.xlu1 %v1694_v18 }
 0x2ff   : > { %v1606_v21 = vpop.xlane.xlu0 %1605  ;;  %v1591_v22 = vpop.xlane.xlu1 %1590 }
 0x300   : > { %vm1607_vm4 = vcmp.eq.f32.partialorder %v1604_v61, %v1606_v21  ;;  %vm1592_vm5 = vcmp.eq.f32.partialorder %v1589_v62, %v1591_v22  ;;  %v1612_v51 = vcvt.f32.s32 %v1606_v21  ;;  %v1597_v52 = vcvt.f32.s32 %v1591_v22 }
 0x301   : > { %v1608_v27 = vsel %vm1607_vm4, %v1603_v23, -inf  ;;  %v1593_v28 = vsel %vm1592_vm5, %v1588_v24, -inf }
 0x302   : > { %1609 = vmax.xlane.f32.xlu1 %v1608_v27  ;;  %1594 = vmax.xlane.f32.xlu0 %v1593_v28  ;;  %v1613_v60 = vshll.u32 %v1612_v51, 16  ;;  %v1598_v61 = vshll.u32 %v1597_v52, 16 }
 0x303   : > { %v1621_v0 = vpop.xlane.xlu0 %1620  ;;  %v1636_v30 = vpop.xlane.xlu1 %1635 }
 0x304   : > { %vm1637_vm6 = vcmp.eq.f32.partialorder %v1634_v7, %v1636_v30  ;;  %vm1622_vm7 = vcmp.eq.f32.partialorder %v1619_v6, %v1621_v0  ;;  %v1627_v55 = vcvt.f32.s32 %v1621_v0  ;;  %v1642_v57 = vcvt.f32.s32 %v1636_v30 }
 0x305   : > { %v1638_v35 = vsel %vm1637_vm6, %v1633_v31, -inf  ;;  %v1623_v36 = vsel %vm1622_vm7, %v1618_v32, -inf }
 0x306   : > { %1639 = vmax.xlane.f32.xlu1 %v1638_v35  ;;  %1624 = vmax.xlane.f32.xlu0 %v1623_v36  ;;  %v1628_v1 = vshll.u32 %v1627_v55, 16  ;;  %v1643_v2 = vshll.u32 %v1642_v57, 16 }
 0x307   : > { %v1651_v37 = vpop.xlane.xlu0 %1650  ;;  %v1666_v38 = vpop.xlane.xlu1 %1665 }
 0x308   : > { %vm1667_vm8 = vcmp.eq.f32.partialorder %v1664_v14, %v1666_v38  ;;  %vm1652_vm9 = vcmp.eq.f32.partialorder %v1649_v13, %v1651_v37  ;;  %v1657_v9 = vcvt.f32.s32 %v1651_v37  ;;  %v1672_v10 = vcvt.f32.s32 %v1666_v38 }
 0x309   : > { %v1668_v43 = vsel %vm1667_vm8, %v1663_v39, -inf  ;;  %v1653_v44 = vsel %vm1652_vm9, %v1648_v40, -inf }
 0x30a   : > { %1669 = vmax.xlane.f32.xlu1 %v1668_v43  ;;  %1654 = vmax.xlane.f32.xlu0 %v1653_v44  ;;  %v1658_v26 = vshll.u32 %v1657_v9, 16  ;;  %v1673_v27 = vshll.u32 %v1672_v10, 16 }
 0x30b   : > { %v1681_v45 = vpop.xlane.xlu0 %1680  ;;  %v1696_v46 = vpop.xlane.xlu1 %1695 }
 0x30c   : > { %vm1697_vm10 = vcmp.eq.f32.partialorder %v1694_v18, %v1696_v46  ;;  %vm1682_vm11 = vcmp.eq.f32.partialorder %v1679_v17, %v1681_v45  ;;  %v1687_v11 = vcvt.f32.s32 %v1681_v45  ;;  %v1702_v13 = vcvt.f32.s32 %v1696_v46 }
 0x30d   : > { %v1698_v49 = vsel %vm1697_vm10, %v1693_v47, -inf  ;;  %v1683_v50 = vsel %vm1682_vm11, %v1678_v48, -inf }
 0x30e   : > { %1699 = vmax.xlane.f32.xlu1 %v1698_v49  ;;  %1684 = vmax.xlane.f32.xlu0 %v1683_v50  ;;  %v1688_v28 = vshll.u32 %v1687_v11, 16  ;;  %v1703_v0 = vshll.u32 %v1702_v13, 16 }
 0x38f   : > { %v1610_v53 = vpop.xlane.xlu1 %1609  ;;  %v1595_v54 = vpop.xlane.xlu0 %1594 }
 0x390   : > { %v1611_v58 = vcvt.f32.s32 %v1610_v53  ;;  %v1596_v59 = vcvt.f32.s32 %v1595_v54 }
 0x392   : > { %v1614_v5 = vadd.s32 %v1613_v60, %v1611_v58  ;;  %v1599_v6 = vadd.s32 %v1598_v61, %v1596_v59 }
 0x393   : > { %v1640_v62 = vpop.xlane.xlu1 %1639  ;;  %v1625_v63 = vpop.xlane.xlu0 %1624 }
 0x394   : > { %v1641_v3 = vcvt.f32.s32 %v1640_v62  ;;  %v1626_v4 = vcvt.f32.s32 %v1625_v63 }
 0x396   : > { %v1644_v7 = vadd.s32 %v1643_v2, %v1641_v3  ;;  %v1629_v8 = vadd.s32 %v1628_v1, %v1626_v4 }
 0x397   : > { %v1670_v14 = vpop.xlane.xlu1 %1669  ;;  %v1655_v15 = vpop.xlane.xlu0 %1654 }
 0x398   : > { %v1721_v16 = vcombine.low %v1614_v5, %v1644_v7  ;;  %v1722_v17 = vcombine.high %v1614_v5, %v1644_v7  ;;  %v1705_v18 = vcombine.low %v1599_v6, %v1629_v8  ;;  %v1706_v19 = vcombine.high %v1599_v6, %v1629_v8 }
 0x399   : > { %v1671_v20 = vcvt.f32.s32 %v1670_v14  ;;  %v1656_v21 = vcvt.f32.s32 %v1655_v15 }
 0x39a   : > { %v1729_v22 = vrot.slane %v1721_v16, %v2742_v12  ;;  %v1736_v23 = vrot.slane %v1722_v17, %v2742_v12  ;;  %v1713_v24 = vrot.slane %v1705_v18, %v2742_v12  ;;  %v1720_v25 = vrot.slane %v1706_v19, %v2742_v12 }
 0x39b   : > { %v1700_v30 = vpop.xlane.xlu1 %1699  ;;  %v1685_v31 = vpop.xlane.xlu0 %1684  ;;  %v1674_v38 = vadd.s32 %v1673_v27, %v1671_v20  ;;  %v1659_v39 = vadd.s32 %v1658_v26, %v1656_v21 }
 0x39c   : > { %v1701_v32 = vcvt.f32.s32 %v1700_v30  ;;  %v1686_v33 = vcvt.f32.s32 %v1685_v31  ;;  %v1770_v34 = vcombine.high %v1713_v24, %v1729_v22  ;;  %v1769_v35 = vcombine.low %v1713_v24, %v1729_v22 }
 0x39d   : > { %v1785_v36 = vcombine.low %v1720_v25, %v1736_v23  ;;  %v1786_v37 = vcombine.high %v1720_v25, %v1736_v23 }
 0x39e   : > { %v1704_v40 = vadd.s32 %v1703_v0, %v1701_v32  ;;  %v1689_v41 = vadd.s32 %v1688_v28, %v1686_v33  ;;  %v1784_v54 = vrot.slane %v1770_v34, %v2748_v29  ;;  %v1777_v55 = vrot.slane %v1769_v35, %v2748_v29 }
 0x39f   : > { %v1793_v57 = vrot.slane %v1785_v36, %v2748_v29 }
 0x3a0   : > { %v1753_v42 = vcombine.low %v1674_v38, %v1704_v40  ;;  %v1754_v43 = vcombine.high %v1674_v38, %v1704_v40  ;;  %v1737_v44 = vcombine.low %v1659_v39, %v1689_v41  ;;  %v1738_v45 = vcombine.high %v1659_v39, %v1689_v41 }
 0x3a2   : > { %v1761_v46 = vrot.slane %v1753_v42, %v2742_v12  ;;  %v1768_v47 = vrot.slane %v1754_v43, %v2742_v12  ;;  %v1745_v48 = vrot.slane %v1737_v44, %v2742_v12  ;;  %v1752_v49 = vrot.slane %v1738_v45, %v2742_v12 }
 0x3a3   : > { %v1800_v12 = vrot.slane %v1786_v37, %v2748_v29 }
 0x3a4   : > { %v1802_v50 = vcombine.high %v1745_v48, %v1761_v46  ;;  %v1801_v51 = vcombine.low %v1745_v48, %v1761_v46  ;;  %v1817_v52 = vcombine.low %v1752_v49, %v1768_v47  ;;  %v1818_v53 = vcombine.high %v1752_v49, %v1768_v47 }
 0x3a6   : > { %v1816_v58 = vrot.slane %v1802_v50, %v2748_v29  ;;  %v1809_v59 = vrot.slane %v1801_v51, %v2748_v29  ;;  %v1825_v60 = vrot.slane %v1817_v52, %v2748_v29  ;;  %v1832_v61 = vrot.slane %v1818_v53, %v2748_v29 }
 0x3a8   : > { %v1835_v62 = vcombine.low %v1784_v54, %v1816_v58  ;;  %v1834_v63 = vcombine.high %v1777_v55, %v1809_v59  ;;  %v1836_v1 = vcombine.high %v1784_v54, %v1816_v58  ;;  %v1837_v2 = vcombine.low %v1793_v57, %v1825_v60 }
 0x3a9   : > { %v1838_v3 = vcombine.high %v1793_v57, %v1825_v60  ;;  %v1839_v4 = vcombine.low %v1800_v12, %v1832_v61  ;;  %v1840_v5 = vcombine.high %v1800_v12, %v1832_v61  ;;  %v1833_v6 = vcombine.low %v1777_v55, %v1809_v59 }
 0x3aa   : > { %1843 = vrot.lane.b32.xlu1 %v1835_v62, %s2447_s10  ;;  %1841 = vrot.lane.b32.xlu0 %v1834_v63, %s2449_s4 }
 0x3ae   : > { %1845 = vrot.lane.b32.xlu1 %v1836_v1, %s2448_s30  ;;  %1847 = vrot.lane.b32.xlu0 %v1837_v2, %s2445_s6  ;;  %s2802_s6 = scalar_lea.hbm %s2858_s3, %s2109_s21 }
 0x3b2   : > { %1849 = vrot.lane.b32.xlu1 %v1838_v3, %s2443_s28  ;;  %1851 = vrot.lane.b32.xlu0 %v1839_v4, %s2446_s9  ;;  %s2452_s9 = smov [#allocation5]  }
 0x3b3   : > { %s2343_s10 = sshll.u32 %s2452_s9, 4  ;;  %s2344_s10 = int_to_ptr.vmem [resolvable:$false] %s2343_s10 }
 0x3b4   : > { %s2345_s30 = scalar_lea.vmem %s2344_s10, 256  ;;  %p2346_p2 = scmp.lt.s32.totalorder %s2804_s25, %s2344_s10 }
 0x3b5   : > { %p2347_p5 = scmp.lt.s32.totalorder %s2345_s30, %s2339_s15 }
 0x3b6   : > { %1853 = vrot.lane.b32.xlu1 %v1840_v5, %s2444_s29 }
 0x3b7   : > { %p2348_p6 = por %p2347_p5, %p2346_p2 }
 0x3b9   : > { %p2349_p7 = pnand %p2348_p6, %p2342_p0 }
 0x41c   : > { %v1844_v29 = vpop.permute.xlu1 %1843  ;;  %v1842_v7 = vpop.permute.xlu0 %1841 }
 0x41d   : > { %v1855_v8 = vsel %vm1584_vm3, %v1833_v6, %v1842_v7 }
 0x41e   : > { %v1856_v10 = vsel %vm332_vm0, %v1855_v8, %v1844_v29 }
 0x420   : > { %v1846_v9 = vpop.permute.xlu1 %1845  ;;  %v1848_v11 = vpop.permute.xlu0 %1847 }
 0x421   : > { %v1858_v13 = vsel %vm1857_vm12, %v1856_v10, %v1846_v9 }
 0x422   : > { %v1860_v14 = vsel %vm1859_vm13, %v1858_v13, %v1848_v11 }
 0x424   : > { %v1850_v15 = vpop.permute.xlu1 %1849  ;;  %v1852_v17 = vpop.permute.xlu0 %1851 }
 0x425   : > { %v1862_v16 = vsel %vm1861_vm14, %v1860_v14, %v1850_v15 }
 0x426   : > { %v1864_v18 = vsel %vm1863_vm15, %v1862_v16, %v1852_v17 }
 0x428   : > { %v1854_v19 = vpop.permute.xlu1 %1853 }
 0x429   : > { %v1866_v20 = vsel %vm1865_vm1, %v1864_v18, %v1854_v19 }
 0x42a   : > { %v1867_v21 = vsub.s32 6, %v1866_v20 }
 0x42c   : > { %v1868_v22 = vadd.s32 127, %v1867_v21  ;;  %v1871_v25 = vsub.s32 127, %v1867_v21 }
 0x42e   : > { %v1869_v23 = vshll.u32 %v1868_v22, 23  ;;  %v1872_v28 = vshll.u32 %v1871_v25, 23 }
 0x430   : > { %v1874_v24 = vmul.f32 %v1869_v23, %v2732_v56 }
 0x432   : > { %v2114_v26 = vround.rtne.f32 %v1874_v24 }
 0x434   : > { %v1876_v27 = vmax.f32 %v2114_v26, -128.0 }
 0x436   : > { %v1877_v0 = vmin.f32 %v1876_v27, 127.0 }
 0x438   : > { %v1878_v30 = vmul.f32 %v1877_v0, %v1872_v28 }
 0x43a   : > { %v1879_v31 = vmax.f32 %v1878_v30, 0.0 }
 0x43c   : > { %1880 = vst [vmem:[%s192_s24] sm:$0xff] %v1879_v31 }
 0x43d   : > { %2352 = shalt.err (!%p2349_p7)
}
 0x43e   : > { %s2353_s4 = scalar_lea.hbm %s2802_s6, 128  ;;  %s2357_s11 = scalar_lea.hbm %s2858_s3, 1024 }
 0x43f   : > { %p2354_p9 = scmp.ne.s32.totalorder %s2802_s6, %s2353_s4  ;;  %p2358_p1 = scmp.lt.u32.totalorder %s2802_s6, %s2858_s3 }
 0x440   : > { %p2359_p4 = scmp.lt.u32.totalorder %s2357_s11, %s2353_s4  ;;  %p2361_p8 = scmp.lt.u32.totalorder %s2353_s4, %s2802_s6 }
 0x441   : > { %p2355_p11 = pnand %p2354_p9, %p2870_p10 }
 0x442   : > { %p2360_p3 = por %p2359_p4, %p2358_p1 }
 0x443   : > { %p2356_p13 = pneg %p2355_p11 }
 0x444   : > { %p2362_p12 = por %p2361_p8, %p2360_p3 }
 0x446   : > { %p2363_p0 = pnand %p2362_p12, %p2356_p13 }
 0x448   : > { %2366 = shalt.err (!%p2363_p0)
}
 0x449   : > { %2119 = dma.vmem_to_hbm [thread:$0]  (%p2870_p10), %s2804_s25, 128, %s2802_s6, %s1882_s16  }
 0x44a PF: > { %p2131_p2 = scmp.ge.s32.totalorder %s2437_s19, 2  ;;  %s1909_s24 = sand.u32 1, %s2409_s12  }
 0x44b   : > { %p2871_p5 = scmp.ne.s32.totalorder %s2864_s27, 0  ;;  %s1910_s28 = scalar_lea.sflag [#allocation4], %s1909_s24 }
 0x44d   : > { %p2126_p6 = pnand %p2131_p2, %p2871_p5 }
 0x44f   : > { %2404 = dma.done.wait (!%p2126_p6), %s1910_s28, 128  }
 0x450   : > { %2406 = vsyncadd (!%p2126_p6), %s1910_s28, 4294967168  ;;  %s17_s19 = sadd.s32 1, %s2437_s19   ;;  %s2872_s12 = smov %s2413_s13 }
 0x451   : > { %p14_p7 = scmp.ge.s32.totalorder %s17_s19, 10   ;;  %s2873_s13 = smov %s2417_s14 }
 0x452   : > { %s2874_s14 = smov %s2552_s5  ;;  %s2875_s15 = smov %s2429_s17 }
 0x453   : > { %s2876_s16 = smov %s2433_s18  ;;  %s2877_s17 = smov %s2880_s22 }
 0x454   : > { %s2878_s18 = smov %s2884_s23  ;;  %16 = sbr.rel (!%p14_p7) target bundleno = 6 (0x6), region = 81 }
 0x45b   :  { %1915 = vsyncpa [#allocation3], 1 }
 0x45c   :  { %1917 = vsyncpa [#allocation3 + $0x1], 1 }
 0x45d   :  { %1918 = vsyncpa [#allocation4], 1 }
 0x45e   :  { %1920 = vsyncpa [#allocation4 + $0x1], 1 }

</bundles_post_ra>
